<compile_context>
chip_gen: v7x
topology: tpu7x:2x2x1
jax: 0.10.0
libtpu: 0.0.40
codegen_flags: <defaults>
</compile_context>

<pallas_src>
import math
import functools

import jax
import jax.numpy as jnp
from jax.experimental import pallas as pl
from jax.experimental.pallas import tpu as pltpu


# -----------------------------------------------------------------------------
# Fused kernel: one grid step == one batch element, activation [T, d_model]
# stays in registers/VMEM for the entire network.
# -----------------------------------------------------------------------------

def _layernorm(s, g, b):
    # PyTorch LayerNorm: biased variance, eps=1e-5 inside the rsqrt.
    mu = jnp.mean(s, axis=-1, keepdims=True)
    var = jnp.mean((s - mu) ** 2, axis=-1, keepdims=True)
    return (s - mu) * jax.lax.rsqrt(var + 1e-5) * g + b


def fused_transformer_kernel(
    src_ref, pe_ref,
    enc_w_ref, enc_b_ref,
    inproj_w_ref, inproj_b_ref,
    outproj_w_ref, outproj_b_ref,
    ff1_w_ref, ff1_b_ref,
    ff2_w_ref, ff2_b_ref,
    ln1_g_ref, ln1_b_ref,
    ln2_g_ref, ln2_b_ref,
    state_w_ref, state_b_ref,
    dec_w_ref, dec_b_ref,
    stateprob_ref, perstate_ref,
    *, nlayers, nhead, d_model,
):
    f32 = jnp.float32
    dh = d_model // nhead
    attn_scale = 1.0 / math.sqrt(dh)

    # Encoder linear * sqrt(d_model) + positional encoding.
    # src_ref: [T, d_input] (batch dim squeezed by BlockSpec), pe_ref: [T, d_model]
    x = (
        jnp.dot(src_ref[...], enc_w_ref[...], preferred_element_type=f32)
        + enc_b_ref[...]
    ) * math.sqrt(d_model) + pe_ref[...]
    # TODO(synk): dropout layers are identity (eval-mode forward).

    for li in range(nlayers):
        # ------------------ multi-head self-attention (post-LN) ------------------
        w_qkv = inproj_w_ref[li]                              # [D, 3D]  (q|k|v cols)
        b_qkv = inproj_b_ref[li:li + 1, :]                    # [1, 3D]
        qkv = jnp.dot(x, w_qkv, preferred_element_type=f32) + b_qkv    # [T, 3D]
        w_o = outproj_w_ref[li]                               # [D, D]

        proj = None
        for h in range(nhead):
            q = qkv[:, h * dh:(h + 1) * dh]
            k = qkv[:, d_model + h * dh: d_model + (h + 1) * dh]
            v = qkv[:, 2 * d_model + h * dh: 2 * d_model + (h + 1) * dh]
            # scores = q @ k^T (contract last dims; no explicit transpose needed)
            s = jax.lax.dot_general(
                q, k, (((1,), (1,)), ((), ())), preferred_element_type=f32
            ) * attn_scale                                    # [T, T]
            s = s - jnp.max(s, axis=-1, keepdims=True)
            e = jnp.exp(s)
            p = e / jnp.sum(e, axis=-1, keepdims=True)
            ho = jnp.dot(p, v, preferred_element_type=f32)    # [T, dh]
            # Fold the output projection per head:
            #   concat_h(ho_h) @ W_o == sum_h ho_h @ W_o[h*dh:(h+1)*dh, :]
            contrib = jnp.dot(
                ho, w_o[h * dh:(h + 1) * dh, :], preferred_element_type=f32
            )
            proj = contrib if proj is None else proj + contrib
        attn = proj + outproj_b_ref[li:li + 1, :]

        x = _layernorm(x + attn, ln1_g_ref[li:li + 1, :], ln1_b_ref[li:li + 1, :])

        # ------------------------- feed-forward (ReLU) ---------------------------
        ff = jnp.maximum(
            jnp.dot(x, ff1_w_ref[li], preferred_element_type=f32)
            + ff1_b_ref[li:li + 1, :],
            0.0,
        )
        ff = (
            jnp.dot(ff, ff2_w_ref[li], preferred_element_type=f32)
            + ff2_b_ref[li:li + 1, :]
        )
        x = _layernorm(x + ff, ln2_g_ref[li:li + 1, :], ln2_b_ref[li:li + 1, :])

    # ----------------------- fused output heads (x read once) --------------------
    logits = jnp.dot(x, state_w_ref[...], preferred_element_type=f32) + state_b_ref[...]
    m = jnp.max(logits, axis=-1, keepdims=True)
    e = jnp.exp(logits - m)
    stateprob_ref[...] = e / jnp.sum(e, axis=-1, keepdims=True)
    # TODO(synk): training-mode minstateprob smoothing skipped (eval-mode forward).
    perstate_ref[...] = (
        jnp.dot(x, dec_w_ref[...], preferred_element_type=f32) + dec_b_ref[...]
    )


# -----------------------------------------------------------------------------
# Forward pass wrapper (single pallas_call, jit-able)
# -----------------------------------------------------------------------------

def positional_encoding(T, d_model):
    # ntokens_per_timepoint == 1 path of PositionalEncoding
    pos = jnp.arange(T, dtype=jnp.float32)[:, None]
    div = jnp.exp(
        jnp.arange(0, d_model, 2, dtype=jnp.float32) * (-math.log(10000.0) / d_model)
    )
    nsin = (d_model + 1) // 2
    ncos = d_model - nsin
    pe = jnp.zeros((T, d_model), jnp.float32)
    pe = pe.at[:, 0::2].set(jnp.sin(pos * div[:nsin]))
    pe = pe.at[:, 1::2].set(jnp.cos(pos * div[:ncos]))
    return pe


def transformer_state_forward(src, params, *, d_model, nhead, nlayers, nstates, d_output):
    # src: [B, T, d_input]; eval mode (dropout identity, src_mask=None)
    B, T, d_input = src.shape
    pe = positional_encoding(T, d_model)

    kern = functools.partial(
        fused_transformer_kernel, nlayers=nlayers, nhead=nhead, d_model=d_model
    )

    def full(arr):
        shp = arr.shape
        n = len(shp)
        return pl.BlockSpec(shp, lambda b, _n=n: (0,) * _n)

    weight_args = (
        pe,
        params["enc_w"], params["enc_b"].reshape(1, -1),
        params["inproj_w"], params["inproj_b"],
        params["outproj_w"], params["outproj_b"],
        params["ff1_w"], params["ff1_b"],
        params["ff2_w"], params["ff2_b"],
        params["ln1_g"], params["ln1_b"],
        params["ln2_g"], params["ln2_b"],
        params["state_w"], params["state_b"].reshape(1, -1),
        params["dec_w"], params["dec_b"].reshape(1, -1),
    )

    stateprob, perstate = pl.pallas_call(
        kern,
        grid=(B,),
        in_specs=[pl.BlockSpec((None, T, d_input), lambda b: (b, 0, 0))]
        + [full(a) for a in weight_args],
        out_specs=(
            pl.BlockSpec((None, T, nstates), lambda b: (b, 0, 0)),
            pl.BlockSpec((None, T, nstates * d_output), lambda b: (b, 0, 0)),
        ),
        out_shape=(
            jax.ShapeDtypeStruct((B, T, nstates), jnp.float32),
            jax.ShapeDtypeStruct((B, T, nstates * d_output), jnp.float32),
        ),
        compiler_params=pltpu.CompilerParams(
            dimension_semantics=("parallel",),   # shard batch across TCs on v7x
        ),
    )(src, *weight_args)

    return {
        "stateprob": stateprob,
        # Same row-major view as the PyTorch .reshape(..., d_output, nstates).
        "perstate": perstate.reshape(B, T, d_output, nstates),
    }


# -----------------------------------------------------------------------------
# Parameters (deterministic synthetic init, PyTorch-like uniform(-1/sqrt(fan_in)))
# -----------------------------------------------------------------------------

def _lin_init(key, fan_in, fan_out):
    kw, kb = jax.random.split(key)
    bound = 1.0 / math.sqrt(fan_in)
    w = jax.random.uniform(kw, (fan_in, fan_out), jnp.float32, -bound, bound)
    b = jax.random.uniform(kb, (fan_out,), jnp.float32, -bound, bound)
    return w, b


def init_params(key, d_input, d_model, nhead, d_hid, nlayers, nstates, d_output):
    keys = jax.random.split(key, 3 + nlayers)
    params = {}
    params["enc_w"], params["enc_b"] = _lin_init(keys[0], d_input, d_model)
    params["state_w"], params["state_b"] = _lin_init(keys[1], d_model, nstates)
    params["dec_w"], params["dec_b"] = _lin_init(keys[2], d_model, nstates * d_output)

    acc = {k: [] for k in (
        "inproj_w", "inproj_b", "outproj_w", "outproj_b",
        "ff1_w", "ff1_b", "ff2_w", "ff2_b",
        "ln1_g", "ln1_b", "ln2_g", "ln2_b")}
    for li in range(nlayers):
        lk = jax.random.split(keys[3 + li], 4)
        w, b = _lin_init(lk[0], d_model, 3 * d_model)      # packed q|k|v columns
        acc["inproj_w"].append(w); acc["inproj_b"].append(b)
        w, b = _lin_init(lk[1], d_model, d_model)
        acc["outproj_w"].append(w); acc["outproj_b"].append(b)
        w, b = _lin_init(lk[2], d_model, d_hid)
        acc["ff1_w"].append(w); acc["ff1_b"].append(b)
        w, b = _lin_init(lk[3], d_hid, d_model)
        acc["ff2_w"].append(w); acc["ff2_b"].append(b)
        acc["ln1_g"].append(jnp.ones((d_model,), jnp.float32))
        acc["ln1_b"].append(jnp.zeros((d_model,), jnp.float32))
        acc["ln2_g"].append(jnp.ones((d_model,), jnp.float32))
        acc["ln2_b"].append(jnp.zeros((d_model,), jnp.float32))
    for k, v in acc.items():
        params[k] = jnp.stack(v, axis=0)   # stacked over layers: [L, ...]
    return params


# -----------------------------------------------------------------------------
# Main
# -----------------------------------------------------------------------------

if __name__ == "__main__":
    # Small shapes consistent with the module's [B, T, d_input] input convention.
    B, T = 2, 8
    d_input, d_model, nhead, d_hid, nlayers = 16, 64, 4, 128, 2
    nstates, d_output = 8, 4

    root = jax.random.PRNGKey(0)
    k_param, k_data = jax.random.split(root)
    params = init_params(k_param, d_input, d_model, nhead, d_hid, nlayers, nstates, d_output)
    src = jax.random.normal(k_data, (B, T, d_input), dtype=jnp.float32)

    fwd = jax.jit(
        functools.partial(
            transformer_state_forward,
            d_model=d_model, nhead=nhead, nlayers=nlayers,
            nstates=nstates, d_output=d_output,
        )
    )
    out = fwd(src, params)
    jax.block_until_ready(out["stateprob"])
    jax.block_until_ready(out["perstate"])

    assert out["stateprob"].shape == (B, T, nstates)
    assert out["perstate"].shape == (B, T, d_output, nstates)
    assert bool(jnp.all(jnp.isfinite(out["stateprob"])))
    assert bool(jnp.all(jnp.isfinite(out["perstate"])))
    assert bool(jnp.allclose(jnp.sum(out["stateprob"], axis=-1), 1.0, atol=1e-5))

    print("KERNEL_OK")
</pallas_src>

<mosaic_0001>
module attributes {stable_mosaic.version = 11 : i64} {
  func.func @fused_transformer_kernel(%arg0: i32, %arg1: memref<1x8x16xf32, #tpu.memory_space<vmem>>, %arg2: memref<8x64xf32, #tpu.memory_space<vmem>>, %arg3: memref<16x64xf32, #tpu.memory_space<vmem>>, %arg4: memref<1x64xf32, #tpu.memory_space<vmem>>, %arg5: memref<2x64x192xf32, #tpu.memory_space<vmem>>, %arg6: memref<2x192xf32, #tpu.memory_space<vmem>>, %arg7: memref<2x64x64xf32, #tpu.memory_space<vmem>>, %arg8: memref<2x64xf32, #tpu.memory_space<vmem>>, %arg9: memref<2x64x128xf32, #tpu.memory_space<vmem>>, %arg10: memref<2x128xf32, #tpu.memory_space<vmem>>, %arg11: memref<2x128x64xf32, #tpu.memory_space<vmem>>, %arg12: memref<2x64xf32, #tpu.memory_space<vmem>>, %arg13: memref<2x64xf32, #tpu.memory_space<vmem>>, %arg14: memref<2x64xf32, #tpu.memory_space<vmem>>, %arg15: memref<2x64xf32, #tpu.memory_space<vmem>>, %arg16: memref<2x64xf32, #tpu.memory_space<vmem>>, %arg17: memref<64x8xf32, #tpu.memory_space<vmem>>, %arg18: memref<1x8xf32, #tpu.memory_space<vmem>>, %arg19: memref<64x32xf32, #tpu.memory_space<vmem>>, %arg20: memref<1x32xf32, #tpu.memory_space<vmem>>, %arg21: memref<1x8x8xf32, #tpu.memory_space<vmem>>, %arg22: memref<1x8x32xf32, #tpu.memory_space<vmem>>) attributes {dimension_semantics = [#tpu.dimension_semantics<parallel>], iteration_bounds = array<i64: 2>, scalar_prefetch = 0 : i64, scratch_operands = 0 : i64, tpu.core_type = #tpu.core_type<tc>, window_params = [{transform_indices = @transform_0, window_bounds = array<i64: 1, 8, 16>}, {pipeline_mode = #tpu.pipeline_mode<synchronous>, transform_indices = @transform_1, window_bounds = array<i64: 8, 64>}, {pipeline_mode = #tpu.pipeline_mode<synchronous>, transform_indices = @transform_2, window_bounds = array<i64: 16, 64>}, {pipeline_mode = #tpu.pipeline_mode<synchronous>, transform_indices = @transform_3, window_bounds = array<i64: 1, 64>}, {pipeline_mode = #tpu.pipeline_mode<synchronous>, transform_indices = @transform_4, window_bounds = array<i64: 2, 64, 192>}, {pipeline_mode = #tpu.pipeline_mode<synchronous>, transform_indices = @transform_5, window_bounds = array<i64: 2, 192>}, {pipeline_mode = #tpu.pipeline_mode<synchronous>, transform_indices = @transform_6, window_bounds = array<i64: 2, 64, 64>}, {pipeline_mode = #tpu.pipeline_mode<synchronous>, transform_indices = @transform_7, window_bounds = array<i64: 2, 64>}, {pipeline_mode = #tpu.pipeline_mode<synchronous>, transform_indices = @transform_8, window_bounds = array<i64: 2, 64, 128>}, {pipeline_mode = #tpu.pipeline_mode<synchronous>, transform_indices = @transform_9, window_bounds = array<i64: 2, 128>}, {pipeline_mode = #tpu.pipeline_mode<synchronous>, transform_indices = @transform_10, window_bounds = array<i64: 2, 128, 64>}, {pipeline_mode = #tpu.pipeline_mode<synchronous>, transform_indices = @transform_11, window_bounds = array<i64: 2, 64>}, {pipeline_mode = #tpu.pipeline_mode<synchronous>, transform_indices = @transform_12, window_bounds = array<i64: 2, 64>}, {pipeline_mode = #tpu.pipeline_mode<synchronous>, transform_indices = @transform_13, window_bounds = array<i64: 2, 64>}, {pipeline_mode = #tpu.pipeline_mode<synchronous>, transform_indices = @transform_14, window_bounds = array<i64: 2, 64>}, {pipeline_mode = #tpu.pipeline_mode<synchronous>, transform_indices = @transform_15, window_bounds = array<i64: 2, 64>}, {pipeline_mode = #tpu.pipeline_mode<synchronous>, transform_indices = @transform_16, window_bounds = array<i64: 64, 8>}, {pipeline_mode = #tpu.pipeline_mode<synchronous>, transform_indices = @transform_17, window_bounds = array<i64: 1, 8>}, {pipeline_mode = #tpu.pipeline_mode<synchronous>, transform_indices = @transform_18, window_bounds = array<i64: 64, 32>}, {pipeline_mode = #tpu.pipeline_mode<synchronous>, transform_indices = @transform_19, window_bounds = array<i64: 1, 32>}, {transform_indices = @transform_20, window_bounds = array<i64: 1, 8, 8>}, {transform_indices = @transform_21, window_bounds = array<i64: 1, 8, 32>}]} {
    %c0 = arith.constant 0 : index
    %c0_0 = arith.constant 0 : index
    %c0_1 = arith.constant 0 : index
    %0 = vector.load %arg1[%c0, %c0_0, %c0_1] : memref<1x8x16xf32, #tpu.memory_space<vmem>>, vector<1x8x16xf32>
    %1 = vector.shape_cast %0 : vector<1x8x16xf32> to vector<8x16xf32>
    %c0_2 = arith.constant 0 : index
    %c0_3 = arith.constant 0 : index
    %2 = vector.load %arg3[%c0_2, %c0_3] : memref<16x64xf32, #tpu.memory_space<vmem>>, vector<16x64xf32>
    %cst = arith.constant dense<0.000000e+00> : vector<8x64xf32>
    %3 = tpu.matmul %1, %2, %cst {dimension_numbers = #tpu.dot_dimension_numbers<[1], [0], [0], [1], [0, 0, 1, 1], [], []>} : vector<8x16xf32>, vector<16x64xf32>, vector<8x64xf32> -> vector<8x64xf32>
    %c0_4 = arith.constant 0 : index
    %c0_5 = arith.constant 0 : index
    %4 = vector.load %arg4[%c0_4, %c0_5] : memref<1x64xf32, #tpu.memory_space<vmem>>, vector<1x64xf32>
    %5 = vector.broadcast %4 : vector<1x64xf32> to vector<8x64xf32>
    %6 = arith.addf %3, %5 : vector<8x64xf32>
    %cst_6 = arith.constant 8.000000e+00 : f32
    %7 = vector.broadcast %cst_6 : f32 to vector<8x64xf32>
    %8 = arith.mulf %6, %7 : vector<8x64xf32>
    %c0_7 = arith.constant 0 : index
    %c0_8 = arith.constant 0 : index
    %9 = vector.load %arg2[%c0_7, %c0_8] : memref<8x64xf32, #tpu.memory_space<vmem>>, vector<8x64xf32>
    %10 = arith.addf %8, %9 : vector<8x64xf32>
    %c0_9 = arith.constant 0 : index
    %c0_10 = arith.constant 0 : index
    %c0_11 = arith.constant 0 : index
    %11 = vector.load %arg5[%c0_9, %c0_10, %c0_11] : memref<2x64x192xf32, #tpu.memory_space<vmem>>, vector<1x64x192xf32>
    %12 = vector.shape_cast %11 : vector<1x64x192xf32> to vector<64x192xf32>
    %c0_12 = arith.constant 0 : index
    %c0_13 = arith.constant 0 : index
    %13 = vector.load %arg6[%c0_12, %c0_13] : memref<2x192xf32, #tpu.memory_space<vmem>>, vector<1x192xf32>
    %cst_14 = arith.constant dense<0.000000e+00> : vector<8x192xf32>
    %14 = tpu.matmul %10, %12, %cst_14 {dimension_numbers = #tpu.dot_dimension_numbers<[1], [0], [0], [1], [0, 0, 1, 1], [], []>} : vector<8x64xf32>, vector<64x192xf32>, vector<8x192xf32> -> vector<8x192xf32>
    %15 = vector.broadcast %13 : vector<1x192xf32> to vector<8x192xf32>
    %16 = arith.addf %14, %15 : vector<8x192xf32>
    %c0_15 = arith.constant 0 : index
    %c0_16 = arith.constant 0 : index
    %c0_17 = arith.constant 0 : index
    %17 = vector.load %arg7[%c0_15, %c0_16, %c0_17] : memref<2x64x64xf32, #tpu.memory_space<vmem>>, vector<1x64x64xf32>
    %18 = vector.shape_cast %17 : vector<1x64x64xf32> to vector<64x64xf32>
    %19 = vector.extract_strided_slice %16 {offsets = [0, 0], sizes = [8, 16], strides = [1, 1]} : vector<8x192xf32> to vector<8x16xf32>
    %20 = vector.extract_strided_slice %16 {offsets = [0, 64], sizes = [8, 16], strides = [1, 1]} : vector<8x192xf32> to vector<8x16xf32>
    %21 = vector.extract_strided_slice %16 {offsets = [0, 128], sizes = [8, 16], strides = [1, 1]} : vector<8x192xf32> to vector<8x16xf32>
    %cst_18 = arith.constant dense<0.000000e+00> : vector<8x8xf32>
    %22 = tpu.matmul %19, %20, %cst_18 {dimension_numbers = #tpu.dot_dimension_numbers<[1], [1], [0], [0], [0, 0, 1, 0], [], []>} : vector<8x16xf32>, vector<8x16xf32>, vector<8x8xf32> -> vector<8x8xf32>
    %cst_19 = arith.constant 2.500000e-01 : f32
    %23 = vector.broadcast %cst_19 : f32 to vector<8x8xf32>
    %24 = arith.mulf %22, %23 : vector<8x8xf32>
    %cst_20 = arith.constant dense<0xFF800000> : vector<8xf32>
    %25 = vector.multi_reduction <maximumf>, %24, %cst_20 [1] : vector<8x8xf32> to vector<8xf32>
    %26 = vector.shape_cast %25 : vector<8xf32> to vector<8x1xf32>
    %27 = vector.broadcast %26 : vector<8x1xf32> to vector<8x8xf32>
    %28 = arith.subf %24, %27 : vector<8x8xf32>
    %29 = math.exp %28 : vector<8x8xf32>
    %cst_21 = arith.constant dense<0.000000e+00> : vector<8xf32>
    %30 = vector.multi_reduction <add>, %29, %cst_21 [1] : vector<8x8xf32> to vector<8xf32>
    %31 = vector.shape_cast %30 : vector<8xf32> to vector<8x1xf32>
    %32 = vector.broadcast %31 : vector<8x1xf32> to vector<8x8xf32>
    %33 = arith.divf %29, %32 : vector<8x8xf32>
    %cst_22 = arith.constant dense<0.000000e+00> : vector<8x16xf32>
    %34 = tpu.matmul %33, %21, %cst_22 {dimension_numbers = #tpu.dot_dimension_numbers<[1], [0], [0], [1], [0, 0, 1, 1], [], []>} : vector<8x8xf32>, vector<8x16xf32>, vector<8x16xf32> -> vector<8x16xf32>
    %35 = vector.extract_strided_slice %18 {offsets = [0, 0], sizes = [16, 64], strides = [1, 1]} : vector<64x64xf32> to vector<16x64xf32>
    %cst_23 = arith.constant dense<0.000000e+00> : vector<8x64xf32>
    %36 = tpu.matmul %34, %35, %cst_23 {dimension_numbers = #tpu.dot_dimension_numbers<[1], [0], [0], [1], [0, 0, 1, 1], [], []>} : vector<8x16xf32>, vector<16x64xf32>, vector<8x64xf32> -> vector<8x64xf32>
    %37 = vector.extract_strided_slice %16 {offsets = [0, 16], sizes = [8, 16], strides = [1, 1]} : vector<8x192xf32> to vector<8x16xf32>
    %38 = vector.extract_strided_slice %16 {offsets = [0, 80], sizes = [8, 16], strides = [1, 1]} : vector<8x192xf32> to vector<8x16xf32>
    %39 = vector.extract_strided_slice %16 {offsets = [0, 144], sizes = [8, 16], strides = [1, 1]} : vector<8x192xf32> to vector<8x16xf32>
    %cst_24 = arith.constant dense<0.000000e+00> : vector<8x8xf32>
    %40 = tpu.matmul %37, %38, %cst_24 {dimension_numbers = #tpu.dot_dimension_numbers<[1], [1], [0], [0], [0, 0, 1, 0], [], []>} : vector<8x16xf32>, vector<8x16xf32>, vector<8x8xf32> -> vector<8x8xf32>
    %cst_25 = arith.constant 2.500000e-01 : f32
    %41 = vector.broadcast %cst_25 : f32 to vector<8x8xf32>
    %42 = arith.mulf %40, %41 : vector<8x8xf32>
    %cst_26 = arith.constant dense<0xFF800000> : vector<8xf32>
    %43 = vector.multi_reduction <maximumf>, %42, %cst_26 [1] : vector<8x8xf32> to vector<8xf32>
    %44 = vector.shape_cast %43 : vector<8xf32> to vector<8x1xf32>
    %45 = vector.broadcast %44 : vector<8x1xf32> to vector<8x8xf32>
    %46 = arith.subf %42, %45 : vector<8x8xf32>
    %47 = math.exp %46 : vector<8x8xf32>
    %cst_27 = arith.constant dense<0.000000e+00> : vector<8xf32>
    %48 = vector.multi_reduction <add>, %47, %cst_27 [1] : vector<8x8xf32> to vector<8xf32>
    %49 = vector.shape_cast %48 : vector<8xf32> to vector<8x1xf32>
    %50 = vector.broadcast %49 : vector<8x1xf32> to vector<8x8xf32>
    %51 = arith.divf %47, %50 : vector<8x8xf32>
    %cst_28 = arith.constant dense<0.000000e+00> : vector<8x16xf32>
    %52 = tpu.matmul %51, %39, %cst_28 {dimension_numbers = #tpu.dot_dimension_numbers<[1], [0], [0], [1], [0, 0, 1, 1], [], []>} : vector<8x8xf32>, vector<8x16xf32>, vector<8x16xf32> -> vector<8x16xf32>
    %53 = vector.extract_strided_slice %18 {offsets = [16, 0], sizes = [16, 64], strides = [1, 1]} : vector<64x64xf32> to vector<16x64xf32>
    %cst_29 = arith.constant dense<0.000000e+00> : vector<8x64xf32>
    %54 = tpu.matmul %52, %53, %cst_29 {dimension_numbers = #tpu.dot_dimension_numbers<[1], [0], [0], [1], [0, 0, 1, 1], [], []>} : vector<8x16xf32>, vector<16x64xf32>, vector<8x64xf32> -> vector<8x64xf32>
    %55 = arith.addf %36, %54 : vector<8x64xf32>
    %56 = vector.extract_strided_slice %16 {offsets = [0, 32], sizes = [8, 16], strides = [1, 1]} : vector<8x192xf32> to vector<8x16xf32>
    %57 = vector.extract_strided_slice %16 {offsets = [0, 96], sizes = [8, 16], strides = [1, 1]} : vector<8x192xf32> to vector<8x16xf32>
    %58 = vector.extract_strided_slice %16 {offsets = [0, 160], sizes = [8, 16], strides = [1, 1]} : vector<8x192xf32> to vector<8x16xf32>
    %cst_30 = arith.constant dense<0.000000e+00> : vector<8x8xf32>
    %59 = tpu.matmul %56, %57, %cst_30 {dimension_numbers = #tpu.dot_dimension_numbers<[1], [1], [0], [0], [0, 0, 1, 0], [], []>} : vector<8x16xf32>, vector<8x16xf32>, vector<8x8xf32> -> vector<8x8xf32>
    %cst_31 = arith.constant 2.500000e-01 : f32
    %60 = vector.broadcast %cst_31 : f32 to vector<8x8xf32>
    %61 = arith.mulf %59, %60 : vector<8x8xf32>
    %cst_32 = arith.constant dense<0xFF800000> : vector<8xf32>
    %62 = vector.multi_reduction <maximumf>, %61, %cst_32 [1] : vector<8x8xf32> to vector<8xf32>
    %63 = vector.shape_cast %62 : vector<8xf32> to vector<8x1xf32>
    %64 = vector.broadcast %63 : vector<8x1xf32> to vector<8x8xf32>
    %65 = arith.subf %61, %64 : vector<8x8xf32>
    %66 = math.exp %65 : vector<8x8xf32>
    %cst_33 = arith.constant dense<0.000000e+00> : vector<8xf32>
    %67 = vector.multi_reduction <add>, %66, %cst_33 [1] : vector<8x8xf32> to vector<8xf32>
    %68 = vector.shape_cast %67 : vector<8xf32> to vector<8x1xf32>
    %69 = vector.broadcast %68 : vector<8x1xf32> to vector<8x8xf32>
    %70 = arith.divf %66, %69 : vector<8x8xf32>
    %cst_34 = arith.constant dense<0.000000e+00> : vector<8x16xf32>
    %71 = tpu.matmul %70, %58, %cst_34 {dimension_numbers = #tpu.dot_dimension_numbers<[1], [0], [0], [1], [0, 0, 1, 1], [], []>} : vector<8x8xf32>, vector<8x16xf32>, vector<8x16xf32> -> vector<8x16xf32>
    %72 = vector.extract_strided_slice %18 {offsets = [32, 0], sizes = [16, 64], strides = [1, 1]} : vector<64x64xf32> to vector<16x64xf32>
    %cst_35 = arith.constant dense<0.000000e+00> : vector<8x64xf32>
    %73 = tpu.matmul %71, %72, %cst_35 {dimension_numbers = #tpu.dot_dimension_numbers<[1], [0], [0], [1], [0, 0, 1, 1], [], []>} : vector<8x16xf32>, vector<16x64xf32>, vector<8x64xf32> -> vector<8x64xf32>
    %74 = arith.addf %55, %73 : vector<8x64xf32>
    %75 = vector.extract_strided_slice %16 {offsets = [0, 48], sizes = [8, 16], strides = [1, 1]} : vector<8x192xf32> to vector<8x16xf32>
    %76 = vector.extract_strided_slice %16 {offsets = [0, 112], sizes = [8, 16], strides = [1, 1]} : vector<8x192xf32> to vector<8x16xf32>
    %77 = vector.extract_strided_slice %16 {offsets = [0, 176], sizes = [8, 16], strides = [1, 1]} : vector<8x192xf32> to vector<8x16xf32>
    %cst_36 = arith.constant dense<0.000000e+00> : vector<8x8xf32>
    %78 = tpu.matmul %75, %76, %cst_36 {dimension_numbers = #tpu.dot_dimension_numbers<[1], [1], [0], [0], [0, 0, 1, 0], [], []>} : vector<8x16xf32>, vector<8x16xf32>, vector<8x8xf32> -> vector<8x8xf32>
    %cst_37 = arith.constant 2.500000e-01 : f32
    %79 = vector.broadcast %cst_37 : f32 to vector<8x8xf32>
    %80 = arith.mulf %78, %79 : vector<8x8xf32>
    %cst_38 = arith.constant dense<0xFF800000> : vector<8xf32>
    %81 = vector.multi_reduction <maximumf>, %80, %cst_38 [1] : vector<8x8xf32> to vector<8xf32>
    %82 = vector.shape_cast %81 : vector<8xf32> to vector<8x1xf32>
    %83 = vector.broadcast %82 : vector<8x1xf32> to vector<8x8xf32>
    %84 = arith.subf %80, %83 : vector<8x8xf32>
    %85 = math.exp %84 : vector<8x8xf32>
    %cst_39 = arith.constant dense<0.000000e+00> : vector<8xf32>
    %86 = vector.multi_reduction <add>, %85, %cst_39 [1] : vector<8x8xf32> to vector<8xf32>
    %87 = vector.shape_cast %86 : vector<8xf32> to vector<8x1xf32>
    %88 = vector.broadcast %87 : vector<8x1xf32> to vector<8x8xf32>
    %89 = arith.divf %85, %88 : vector<8x8xf32>
    %cst_40 = arith.constant dense<0.000000e+00> : vector<8x16xf32>
    %90 = tpu.matmul %89, %77, %cst_40 {dimension_numbers = #tpu.dot_dimension_numbers<[1], [0], [0], [1], [0, 0, 1, 1], [], []>} : vector<8x8xf32>, vector<8x16xf32>, vector<8x16xf32> -> vector<8x16xf32>
    %91 = vector.extract_strided_slice %18 {offsets = [48, 0], sizes = [16, 64], strides = [1, 1]} : vector<64x64xf32> to vector<16x64xf32>
    %cst_41 = arith.constant dense<0.000000e+00> : vector<8x64xf32>
    %92 = tpu.matmul %90, %91, %cst_41 {dimension_numbers = #tpu.dot_dimension_numbers<[1], [0], [0], [1], [0, 0, 1, 1], [], []>} : vector<8x16xf32>, vector<16x64xf32>, vector<8x64xf32> -> vector<8x64xf32>
    %93 = arith.addf %74, %92 : vector<8x64xf32>
    %c0_42 = arith.constant 0 : index
    %c0_43 = arith.constant 0 : index
    %94 = vector.load %arg8[%c0_42, %c0_43] : memref<2x64xf32, #tpu.memory_space<vmem>>, vector<1x64xf32>
    %95 = vector.broadcast %94 : vector<1x64xf32> to vector<8x64xf32>
    %96 = arith.addf %93, %95 : vector<8x64xf32>
    %97 = arith.addf %10, %96 : vector<8x64xf32>
    %c0_44 = arith.constant 0 : index
    %c0_45 = arith.constant 0 : index
    %98 = vector.load %arg13[%c0_44, %c0_45] : memref<2x64xf32, #tpu.memory_space<vmem>>, vector<1x64xf32>
    %c0_46 = arith.constant 0 : index
    %c0_47 = arith.constant 0 : index
    %99 = vector.load %arg14[%c0_46, %c0_47] : memref<2x64xf32, #tpu.memory_space<vmem>>, vector<1x64xf32>
    %cst_48 = arith.constant dense<0.000000e+00> : vector<8xf32>
    %100 = vector.multi_reduction <add>, %97, %cst_48 [1] : vector<8x64xf32> to vector<8xf32>
    %101 = vector.shape_cast %100 : vector<8xf32> to vector<8x1xf32>
    %cst_49 = arith.constant 6.400000e+01 : f32
    %102 = vector.broadcast %cst_49 : f32 to vector<8x1xf32>
    %103 = arith.divf %101, %102 : vector<8x1xf32>
    %104 = vector.broadcast %103 : vector<8x1xf32> to vector<8x64xf32>
    %105 = arith.subf %97, %104 : vector<8x64xf32>
    %106 = arith.mulf %105, %105 : vector<8x64xf32>
    %cst_50 = arith.constant dense<0.000000e+00> : vector<8xf32>
    %107 = vector.multi_reduction <add>, %106, %cst_50 [1] : vector<8x64xf32> to vector<8xf32>
    %108 = vector.shape_cast %107 : vector<8xf32> to vector<8x1xf32>
    %cst_51 = arith.constant 6.400000e+01 : f32
    %109 = vector.broadcast %cst_51 : f32 to vector<8x1xf32>
    %110 = arith.divf %108, %109 : vector<8x1xf32>
    %111 = vector.broadcast %103 : vector<8x1xf32> to vector<8x64xf32>
    %112 = arith.subf %97, %111 : vector<8x64xf32>
    %cst_52 = arith.constant 9.99999974E-6 : f32
    %113 = vector.broadcast %cst_52 : f32 to vector<8x1xf32>
    %114 = arith.addf %110, %113 : vector<8x1xf32>
    %115 = math.rsqrt %114 : vector<8x1xf32>
    %116 = vector.broadcast %115 : vector<8x1xf32> to vector<8x64xf32>
    %117 = arith.mulf %112, %116 : vector<8x64xf32>
    %118 = vector.broadcast %98 : vector<1x64xf32> to vector<8x64xf32>
    %119 = arith.mulf %117, %118 : vector<8x64xf32>
    %120 = vector.broadcast %99 : vector<1x64xf32> to vector<8x64xf32>
    %121 = arith.addf %119, %120 : vector<8x64xf32>
    %c0_53 = arith.constant 0 : index
    %c0_54 = arith.constant 0 : index
    %c0_55 = arith.constant 0 : index
    %122 = vector.load %arg9[%c0_53, %c0_54, %c0_55] : memref<2x64x128xf32, #tpu.memory_space<vmem>>, vector<1x64x128xf32>
    %123 = vector.shape_cast %122 : vector<1x64x128xf32> to vector<64x128xf32>
    %cst_56 = arith.constant dense<0.000000e+00> : vector<8x128xf32>
    %124 = tpu.matmul %121, %123, %cst_56 {dimension_numbers = #tpu.dot_dimension_numbers<[1], [0], [0], [1], [0, 0, 1, 1], [], []>} : vector<8x64xf32>, vector<64x128xf32>, vector<8x128xf32> -> vector<8x128xf32>
    %c0_57 = arith.constant 0 : index
    %c0_58 = arith.constant 0 : index
    %125 = vector.load %arg10[%c0_57, %c0_58] : memref<2x128xf32, #tpu.memory_space<vmem>>, vector<1x128xf32>
    %126 = vector.broadcast %125 : vector<1x128xf32> to vector<8x128xf32>
    %127 = arith.addf %124, %126 : vector<8x128xf32>
    %cst_59 = arith.constant 0.000000e+00 : f32
    %128 = vector.broadcast %cst_59 : f32 to vector<8x128xf32>
    %129 = arith.maximumf %127, %128 : vector<8x128xf32>
    %c0_60 = arith.constant 0 : index
    %c0_61 = arith.constant 0 : index
    %c0_62 = arith.constant 0 : index
    %130 = vector.load %arg11[%c0_60, %c0_61, %c0_62] : memref<2x128x64xf32, #tpu.memory_space<vmem>>, vector<1x128x64xf32>
    %131 = vector.shape_cast %130 : vector<1x128x64xf32> to vector<128x64xf32>
    %cst_63 = arith.constant dense<0.000000e+00> : vector<8x64xf32>
    %132 = tpu.matmul %129, %131, %cst_63 {dimension_numbers = #tpu.dot_dimension_numbers<[1], [0], [0], [1], [0, 0, 1, 1], [], []>} : vector<8x128xf32>, vector<128x64xf32>, vector<8x64xf32> -> vector<8x64xf32>
    %c0_64 = arith.constant 0 : index
    %c0_65 = arith.constant 0 : index
    %133 = vector.load %arg12[%c0_64, %c0_65] : memref<2x64xf32, #tpu.memory_space<vmem>>, vector<1x64xf32>
    %134 = vector.broadcast %133 : vector<1x64xf32> to vector<8x64xf32>
    %135 = arith.addf %132, %134 : vector<8x64xf32>
    %136 = arith.addf %121, %135 : vector<8x64xf32>
    %c0_66 = arith.constant 0 : index
    %c0_67 = arith.constant 0 : index
    %137 = vector.load %arg15[%c0_66, %c0_67] : memref<2x64xf32, #tpu.memory_space<vmem>>, vector<1x64xf32>
    %c0_68 = arith.constant 0 : index
    %c0_69 = arith.constant 0 : index
    %138 = vector.load %arg16[%c0_68, %c0_69] : memref<2x64xf32, #tpu.memory_space<vmem>>, vector<1x64xf32>
    %cst_70 = arith.constant dense<0.000000e+00> : vector<8xf32>
    %139 = vector.multi_reduction <add>, %136, %cst_70 [1] : vector<8x64xf32> to vector<8xf32>
    %140 = vector.shape_cast %139 : vector<8xf32> to vector<8x1xf32>
    %cst_71 = arith.constant 6.400000e+01 : f32
    %141 = vector.broadcast %cst_71 : f32 to vector<8x1xf32>
    %142 = arith.divf %140, %141 : vector<8x1xf32>
    %143 = vector.broadcast %142 : vector<8x1xf32> to vector<8x64xf32>
    %144 = arith.subf %136, %143 : vector<8x64xf32>
    %145 = arith.mulf %144, %144 : vector<8x64xf32>
    %cst_72 = arith.constant dense<0.000000e+00> : vector<8xf32>
    %146 = vector.multi_reduction <add>, %145, %cst_72 [1] : vector<8x64xf32> to vector<8xf32>
    %147 = vector.shape_cast %146 : vector<8xf32> to vector<8x1xf32>
    %cst_73 = arith.constant 6.400000e+01 : f32
    %148 = vector.broadcast %cst_73 : f32 to vector<8x1xf32>
    %149 = arith.divf %147, %148 : vector<8x1xf32>
    %150 = vector.broadcast %142 : vector<8x1xf32> to vector<8x64xf32>
    %151 = arith.subf %136, %150 : vector<8x64xf32>
    %cst_74 = arith.constant 9.99999974E-6 : f32
    %152 = vector.broadcast %cst_74 : f32 to vector<8x1xf32>
    %153 = arith.addf %149, %152 : vector<8x1xf32>
    %154 = math.rsqrt %153 : vector<8x1xf32>
    %155 = vector.broadcast %154 : vector<8x1xf32> to vector<8x64xf32>
    %156 = arith.mulf %151, %155 : vector<8x64xf32>
    %157 = vector.broadcast %137 : vector<1x64xf32> to vector<8x64xf32>
    %158 = arith.mulf %156, %157 : vector<8x64xf32>
    %159 = vector.broadcast %138 : vector<1x64xf32> to vector<8x64xf32>
    %160 = arith.addf %158, %159 : vector<8x64xf32>
    %c1 = arith.constant 1 : index
    %c0_75 = arith.constant 0 : index
    %c0_76 = arith.constant 0 : index
    %161 = vector.load %arg5[%c1, %c0_75, %c0_76] : memref<2x64x192xf32, #tpu.memory_space<vmem>>, vector<1x64x192xf32>
    %162 = vector.shape_cast %161 : vector<1x64x192xf32> to vector<64x192xf32>
    %c1_77 = arith.constant 1 : index
    %c0_78 = arith.constant 0 : index
    %163 = vector.load %arg6[%c1_77, %c0_78] : memref<2x192xf32, #tpu.memory_space<vmem>>, vector<1x192xf32>
    %cst_79 = arith.constant dense<0.000000e+00> : vector<8x192xf32>
    %164 = tpu.matmul %160, %162, %cst_79 {dimension_numbers = #tpu.dot_dimension_numbers<[1], [0], [0], [1], [0, 0, 1, 1], [], []>} : vector<8x64xf32>, vector<64x192xf32>, vector<8x192xf32> -> vector<8x192xf32>
    %165 = vector.broadcast %163 : vector<1x192xf32> to vector<8x192xf32>
    %166 = arith.addf %164, %165 : vector<8x192xf32>
    %c1_80 = arith.constant 1 : index
    %c0_81 = arith.constant 0 : index
    %c0_82 = arith.constant 0 : index
    %167 = vector.load %arg7[%c1_80, %c0_81, %c0_82] : memref<2x64x64xf32, #tpu.memory_space<vmem>>, vector<1x64x64xf32>
    %168 = vector.shape_cast %167 : vector<1x64x64xf32> to vector<64x64xf32>
    %169 = vector.extract_strided_slice %166 {offsets = [0, 0], sizes = [8, 16], strides = [1, 1]} : vector<8x192xf32> to vector<8x16xf32>
    %170 = vector.extract_strided_slice %166 {offsets = [0, 64], sizes = [8, 16], strides = [1, 1]} : vector<8x192xf32> to vector<8x16xf32>
    %171 = vector.extract_strided_slice %166 {offsets = [0, 128], sizes = [8, 16], strides = [1, 1]} : vector<8x192xf32> to vector<8x16xf32>
    %cst_83 = arith.constant dense<0.000000e+00> : vector<8x8xf32>
    %172 = tpu.matmul %169, %170, %cst_83 {dimension_numbers = #tpu.dot_dimension_numbers<[1], [1], [0], [0], [0, 0, 1, 0], [], []>} : vector<8x16xf32>, vector<8x16xf32>, vector<8x8xf32> -> vector<8x8xf32>
    %cst_84 = arith.constant 2.500000e-01 : f32
    %173 = vector.broadcast %cst_84 : f32 to vector<8x8xf32>
    %174 = arith.mulf %172, %173 : vector<8x8xf32>
    %cst_85 = arith.constant dense<0xFF800000> : vector<8xf32>
    %175 = vector.multi_reduction <maximumf>, %174, %cst_85 [1] : vector<8x8xf32> to vector<8xf32>
    %176 = vector.shape_cast %175 : vector<8xf32> to vector<8x1xf32>
    %177 = vector.broadcast %176 : vector<8x1xf32> to vector<8x8xf32>
    %178 = arith.subf %174, %177 : vector<8x8xf32>
    %179 = math.exp %178 : vector<8x8xf32>
    %cst_86 = arith.constant dense<0.000000e+00> : vector<8xf32>
    %180 = vector.multi_reduction <add>, %179, %cst_86 [1] : vector<8x8xf32> to vector<8xf32>
    %181 = vector.shape_cast %180 : vector<8xf32> to vector<8x1xf32>
    %182 = vector.broadcast %181 : vector<8x1xf32> to vector<8x8xf32>
    %183 = arith.divf %179, %182 : vector<8x8xf32>
    %cst_87 = arith.constant dense<0.000000e+00> : vector<8x16xf32>
    %184 = tpu.matmul %183, %171, %cst_87 {dimension_numbers = #tpu.dot_dimension_numbers<[1], [0], [0], [1], [0, 0, 1, 1], [], []>} : vector<8x8xf32>, vector<8x16xf32>, vector<8x16xf32> -> vector<8x16xf32>
    %185 = vector.extract_strided_slice %168 {offsets = [0, 0], sizes = [16, 64], strides = [1, 1]} : vector<64x64xf32> to vector<16x64xf32>
    %cst_88 = arith.constant dense<0.000000e+00> : vector<8x64xf32>
    %186 = tpu.matmul %184, %185, %cst_88 {dimension_numbers = #tpu.dot_dimension_numbers<[1], [0], [0], [1], [0, 0, 1, 1], [], []>} : vector<8x16xf32>, vector<16x64xf32>, vector<8x64xf32> -> vector<8x64xf32>
    %187 = vector.extract_strided_slice %166 {offsets = [0, 16], sizes = [8, 16], strides = [1, 1]} : vector<8x192xf32> to vector<8x16xf32>
    %188 = vector.extract_strided_slice %166 {offsets = [0, 80], sizes = [8, 16], strides = [1, 1]} : vector<8x192xf32> to vector<8x16xf32>
    %189 = vector.extract_strided_slice %166 {offsets = [0, 144], sizes = [8, 16], strides = [1, 1]} : vector<8x192xf32> to vector<8x16xf32>
    %cst_89 = arith.constant dense<0.000000e+00> : vector<8x8xf32>
    %190 = tpu.matmul %187, %188, %cst_89 {dimension_numbers = #tpu.dot_dimension_numbers<[1], [1], [0], [0], [0, 0, 1, 0], [], []>} : vector<8x16xf32>, vector<8x16xf32>, vector<8x8xf32> -> vector<8x8xf32>
    %cst_90 = arith.constant 2.500000e-01 : f32
    %191 = vector.broadcast %cst_90 : f32 to vector<8x8xf32>
    %192 = arith.mulf %190, %191 : vector<8x8xf32>
    %cst_91 = arith.constant dense<0xFF800000> : vector<8xf32>
    %193 = vector.multi_reduction <maximumf>, %192, %cst_91 [1] : vector<8x8xf32> to vector<8xf32>
    %194 = vector.shape_cast %193 : vector<8xf32> to vector<8x1xf32>
    %195 = vector.broadcast %194 : vector<8x1xf32> to vector<8x8xf32>
    %196 = arith.subf %192, %195 : vector<8x8xf32>
    %197 = math.exp %196 : vector<8x8xf32>
    %cst_92 = arith.constant dense<0.000000e+00> : vector<8xf32>
    %198 = vector.multi_reduction <add>, %197, %cst_92 [1] : vector<8x8xf32> to vector<8xf32>
    %199 = vector.shape_cast %198 : vector<8xf32> to vector<8x1xf32>
    %200 = vector.broadcast %199 : vector<8x1xf32> to vector<8x8xf32>
    %201 = arith.divf %197, %200 : vector<8x8xf32>
    %cst_93 = arith.constant dense<0.000000e+00> : vector<8x16xf32>
    %202 = tpu.matmul %201, %189, %cst_93 {dimension_numbers = #tpu.dot_dimension_numbers<[1], [0], [0], [1], [0, 0, 1, 1], [], []>} : vector<8x8xf32>, vector<8x16xf32>, vector<8x16xf32> -> vector<8x16xf32>
    %203 = vector.extract_strided_slice %168 {offsets = [16, 0], sizes = [16, 64], strides = [1, 1]} : vector<64x64xf32> to vector<16x64xf32>
    %cst_94 = arith.constant dense<0.000000e+00> : vector<8x64xf32>
    %204 = tpu.matmul %202, %203, %cst_94 {dimension_numbers = #tpu.dot_dimension_numbers<[1], [0], [0], [1], [0, 0, 1, 1], [], []>} : vector<8x16xf32>, vector<16x64xf32>, vector<8x64xf32> -> vector<8x64xf32>
    %205 = arith.addf %186, %204 : vector<8x64xf32>
    %206 = vector.extract_strided_slice %166 {offsets = [0, 32], sizes = [8, 16], strides = [1, 1]} : vector<8x192xf32> to vector<8x16xf32>
    %207 = vector.extract_strided_slice %166 {offsets = [0, 96], sizes = [8, 16], strides = [1, 1]} : vector<8x192xf32> to vector<8x16xf32>
    %208 = vector.extract_strided_slice %166 {offsets = [0, 160], sizes = [8, 16], strides = [1, 1]} : vector<8x192xf32> to vector<8x16xf32>
    %cst_95 = arith.constant dense<0.000000e+00> : vector<8x8xf32>
    %209 = tpu.matmul %206, %207, %cst_95 {dimension_numbers = #tpu.dot_dimension_numbers<[1], [1], [0], [0], [0, 0, 1, 0], [], []>} : vector<8x16xf32>, vector<8x16xf32>, vector<8x8xf32> -> vector<8x8xf32>
    %cst_96 = arith.constant 2.500000e-01 : f32
    %210 = vector.broadcast %cst_96 : f32 to vector<8x8xf32>
    %211 = arith.mulf %209, %210 : vector<8x8xf32>
    %cst_97 = arith.constant dense<0xFF800000> : vector<8xf32>
    %212 = vector.multi_reduction <maximumf>, %211, %cst_97 [1] : vector<8x8xf32> to vector<8xf32>
    %213 = vector.shape_cast %212 : vector<8xf32> to vector<8x1xf32>
    %214 = vector.broadcast %213 : vector<8x1xf32> to vector<8x8xf32>
    %215 = arith.subf %211, %214 : vector<8x8xf32>
    %216 = math.exp %215 : vector<8x8xf32>
    %cst_98 = arith.constant dense<0.000000e+00> : vector<8xf32>
    %217 = vector.multi_reduction <add>, %216, %cst_98 [1] : vector<8x8xf32> to vector<8xf32>
    %218 = vector.shape_cast %217 : vector<8xf32> to vector<8x1xf32>
    %219 = vector.broadcast %218 : vector<8x1xf32> to vector<8x8xf32>
    %220 = arith.divf %216, %219 : vector<8x8xf32>
    %cst_99 = arith.constant dense<0.000000e+00> : vector<8x16xf32>
    %221 = tpu.matmul %220, %208, %cst_99 {dimension_numbers = #tpu.dot_dimension_numbers<[1], [0], [0], [1], [0, 0, 1, 1], [], []>} : vector<8x8xf32>, vector<8x16xf32>, vector<8x16xf32> -> vector<8x16xf32>
    %222 = vector.extract_strided_slice %168 {offsets = [32, 0], sizes = [16, 64], strides = [1, 1]} : vector<64x64xf32> to vector<16x64xf32>
    %cst_100 = arith.constant dense<0.000000e+00> : vector<8x64xf32>
    %223 = tpu.matmul %221, %222, %cst_100 {dimension_numbers = #tpu.dot_dimension_numbers<[1], [0], [0], [1], [0, 0, 1, 1], [], []>} : vector<8x16xf32>, vector<16x64xf32>, vector<8x64xf32> -> vector<8x64xf32>
    %224 = arith.addf %205, %223 : vector<8x64xf32>
    %225 = vector.extract_strided_slice %166 {offsets = [0, 48], sizes = [8, 16], strides = [1, 1]} : vector<8x192xf32> to vector<8x16xf32>
    %226 = vector.extract_strided_slice %166 {offsets = [0, 112], sizes = [8, 16], strides = [1, 1]} : vector<8x192xf32> to vector<8x16xf32>
    %227 = vector.extract_strided_slice %166 {offsets = [0, 176], sizes = [8, 16], strides = [1, 1]} : vector<8x192xf32> to vector<8x16xf32>
    %cst_101 = arith.constant dense<0.000000e+00> : vector<8x8xf32>
    %228 = tpu.matmul %225, %226, %cst_101 {dimension_numbers = #tpu.dot_dimension_numbers<[1], [1], [0], [0], [0, 0, 1, 0], [], []>} : vector<8x16xf32>, vector<8x16xf32>, vector<8x8xf32> -> vector<8x8xf32>
    %cst_102 = arith.constant 2.500000e-01 : f32
    %229 = vector.broadcast %cst_102 : f32 to vector<8x8xf32>
    %230 = arith.mulf %228, %229 : vector<8x8xf32>
    %cst_103 = arith.constant dense<0xFF800000> : vector<8xf32>
    %231 = vector.multi_reduction <maximumf>, %230, %cst_103 [1] : vector<8x8xf32> to vector<8xf32>
    %232 = vector.shape_cast %231 : vector<8xf32> to vector<8x1xf32>
    %233 = vector.broadcast %232 : vector<8x1xf32> to vector<8x8xf32>
    %234 = arith.subf %230, %233 : vector<8x8xf32>
    %235 = math.exp %234 : vector<8x8xf32>
    %cst_104 = arith.constant dense<0.000000e+00> : vector<8xf32>
    %236 = vector.multi_reduction <add>, %235, %cst_104 [1] : vector<8x8xf32> to vector<8xf32>
    %237 = vector.shape_cast %236 : vector<8xf32> to vector<8x1xf32>
    %238 = vector.broadcast %237 : vector<8x1xf32> to vector<8x8xf32>
    %239 = arith.divf %235, %238 : vector<8x8xf32>
    %cst_105 = arith.constant dense<0.000000e+00> : vector<8x16xf32>
    %240 = tpu.matmul %239, %227, %cst_105 {dimension_numbers = #tpu.dot_dimension_numbers<[1], [0], [0], [1], [0, 0, 1, 1], [], []>} : vector<8x8xf32>, vector<8x16xf32>, vector<8x16xf32> -> vector<8x16xf32>
    %241 = vector.extract_strided_slice %168 {offsets = [48, 0], sizes = [16, 64], strides = [1, 1]} : vector<64x64xf32> to vector<16x64xf32>
    %cst_106 = arith.constant dense<0.000000e+00> : vector<8x64xf32>
    %242 = tpu.matmul %240, %241, %cst_106 {dimension_numbers = #tpu.dot_dimension_numbers<[1], [0], [0], [1], [0, 0, 1, 1], [], []>} : vector<8x16xf32>, vector<16x64xf32>, vector<8x64xf32> -> vector<8x64xf32>
    %243 = arith.addf %224, %242 : vector<8x64xf32>
    %c1_107 = arith.constant 1 : index
    %c0_108 = arith.constant 0 : index
    %244 = vector.load %arg8[%c1_107, %c0_108] : memref<2x64xf32, #tpu.memory_space<vmem>>, vector<1x64xf32>
    %245 = vector.broadcast %244 : vector<1x64xf32> to vector<8x64xf32>
    %246 = arith.addf %243, %245 : vector<8x64xf32>
    %247 = arith.addf %160, %246 : vector<8x64xf32>
    %c1_109 = arith.constant 1 : index
    %c0_110 = arith.constant 0 : index
    %248 = vector.load %arg13[%c1_109, %c0_110] : memref<2x64xf32, #tpu.memory_space<vmem>>, vector<1x64xf32>
    %c1_111 = arith.constant 1 : index
    %c0_112 = arith.constant 0 : index
    %249 = vector.load %arg14[%c1_111, %c0_112] : memref<2x64xf32, #tpu.memory_space<vmem>>, vector<1x64xf32>
    %cst_113 = arith.constant dense<0.000000e+00> : vector<8xf32>
    %250 = vector.multi_reduction <add>, %247, %cst_113 [1] : vector<8x64xf32> to vector<8xf32>
    %251 = vector.shape_cast %250 : vector<8xf32> to vector<8x1xf32>
    %cst_114 = arith.constant 6.400000e+01 : f32
    %252 = vector.broadcast %cst_114 : f32 to vector<8x1xf32>
    %253 = arith.divf %251, %252 : vector<8x1xf32>
    %254 = vector.broadcast %253 : vector<8x1xf32> to vector<8x64xf32>
    %255 = arith.subf %247, %254 : vector<8x64xf32>
    %256 = arith.mulf %255, %255 : vector<8x64xf32>
    %cst_115 = arith.constant dense<0.000000e+00> : vector<8xf32>
    %257 = vector.multi_reduction <add>, %256, %cst_115 [1] : vector<8x64xf32> to vector<8xf32>
    %258 = vector.shape_cast %257 : vector<8xf32> to vector<8x1xf32>
    %cst_116 = arith.constant 6.400000e+01 : f32
    %259 = vector.broadcast %cst_116 : f32 to vector<8x1xf32>
    %260 = arith.divf %258, %259 : vector<8x1xf32>
    %261 = vector.broadcast %253 : vector<8x1xf32> to vector<8x64xf32>
    %262 = arith.subf %247, %261 : vector<8x64xf32>
    %cst_117 = arith.constant 9.99999974E-6 : f32
    %263 = vector.broadcast %cst_117 : f32 to vector<8x1xf32>
    %264 = arith.addf %260, %263 : vector<8x1xf32>
    %265 = math.rsqrt %264 : vector<8x1xf32>
    %266 = vector.broadcast %265 : vector<8x1xf32> to vector<8x64xf32>
    %267 = arith.mulf %262, %266 : vector<8x64xf32>
    %268 = vector.broadcast %248 : vector<1x64xf32> to vector<8x64xf32>
    %269 = arith.mulf %267, %268 : vector<8x64xf32>
    %270 = vector.broadcast %249 : vector<1x64xf32> to vector<8x64xf32>
    %271 = arith.addf %269, %270 : vector<8x64xf32>
    %c1_118 = arith.constant 1 : index
    %c0_119 = arith.constant 0 : index
    %c0_120 = arith.constant 0 : index
    %272 = vector.load %arg9[%c1_118, %c0_119, %c0_120] : memref<2x64x128xf32, #tpu.memory_space<vmem>>, vector<1x64x128xf32>
    %273 = vector.shape_cast %272 : vector<1x64x128xf32> to vector<64x128xf32>
    %cst_121 = arith.constant dense<0.000000e+00> : vector<8x128xf32>
    %274 = tpu.matmul %271, %273, %cst_121 {dimension_numbers = #tpu.dot_dimension_numbers<[1], [0], [0], [1], [0, 0, 1, 1], [], []>} : vector<8x64xf32>, vector<64x128xf32>, vector<8x128xf32> -> vector<8x128xf32>
    %c1_122 = arith.constant 1 : index
    %c0_123 = arith.constant 0 : index
    %275 = vector.load %arg10[%c1_122, %c0_123] : memref<2x128xf32, #tpu.memory_space<vmem>>, vector<1x128xf32>
    %276 = vector.broadcast %275 : vector<1x128xf32> to vector<8x128xf32>
    %277 = arith.addf %274, %276 : vector<8x128xf32>
    %cst_124 = arith.constant 0.000000e+00 : f32
    %278 = vector.broadcast %cst_124 : f32 to vector<8x128xf32>
    %279 = arith.maximumf %277, %278 : vector<8x128xf32>
    %c1_125 = arith.constant 1 : index
    %c0_126 = arith.constant 0 : index
    %c0_127 = arith.constant 0 : index
    %280 = vector.load %arg11[%c1_125, %c0_126, %c0_127] : memref<2x128x64xf32, #tpu.memory_space<vmem>>, vector<1x128x64xf32>
    %281 = vector.shape_cast %280 : vector<1x128x64xf32> to vector<128x64xf32>
    %cst_128 = arith.constant dense<0.000000e+00> : vector<8x64xf32>
    %282 = tpu.matmul %279, %281, %cst_128 {dimension_numbers = #tpu.dot_dimension_numbers<[1], [0], [0], [1], [0, 0, 1, 1], [], []>} : vector<8x128xf32>, vector<128x64xf32>, vector<8x64xf32> -> vector<8x64xf32>
    %c1_129 = arith.constant 1 : index
    %c0_130 = arith.constant 0 : index
    %283 = vector.load %arg12[%c1_129, %c0_130] : memref<2x64xf32, #tpu.memory_space<vmem>>, vector<1x64xf32>
    %284 = vector.broadcast %283 : vector<1x64xf32> to vector<8x64xf32>
    %285 = arith.addf %282, %284 : vector<8x64xf32>
    %286 = arith.addf %271, %285 : vector<8x64xf32>
    %c1_131 = arith.constant 1 : index
    %c0_132 = arith.constant 0 : index
    %287 = vector.load %arg15[%c1_131, %c0_132] : memref<2x64xf32, #tpu.memory_space<vmem>>, vector<1x64xf32>
    %c1_133 = arith.constant 1 : index
    %c0_134 = arith.constant 0 : index
    %288 = vector.load %arg16[%c1_133, %c0_134] : memref<2x64xf32, #tpu.memory_space<vmem>>, vector<1x64xf32>
    %cst_135 = arith.constant dense<0.000000e+00> : vector<8xf32>
    %289 = vector.multi_reduction <add>, %286, %cst_135 [1] : vector<8x64xf32> to vector<8xf32>
    %290 = vector.shape_cast %289 : vector<8xf32> to vector<8x1xf32>
    %cst_136 = arith.constant 6.400000e+01 : f32
    %291 = vector.broadcast %cst_136 : f32 to vector<8x1xf32>
    %292 = arith.divf %290, %291 : vector<8x1xf32>
    %293 = vector.broadcast %292 : vector<8x1xf32> to vector<8x64xf32>
    %294 = arith.subf %286, %293 : vector<8x64xf32>
    %295 = arith.mulf %294, %294 : vector<8x64xf32>
    %cst_137 = arith.constant dense<0.000000e+00> : vector<8xf32>
    %296 = vector.multi_reduction <add>, %295, %cst_137 [1] : vector<8x64xf32> to vector<8xf32>
    %297 = vector.shape_cast %296 : vector<8xf32> to vector<8x1xf32>
    %cst_138 = arith.constant 6.400000e+01 : f32
    %298 = vector.broadcast %cst_138 : f32 to vector<8x1xf32>
    %299 = arith.divf %297, %298 : vector<8x1xf32>
    %300 = vector.broadcast %292 : vector<8x1xf32> to vector<8x64xf32>
    %301 = arith.subf %286, %300 : vector<8x64xf32>
    %cst_139 = arith.constant 9.99999974E-6 : f32
    %302 = vector.broadcast %cst_139 : f32 to vector<8x1xf32>
    %303 = arith.addf %299, %302 : vector<8x1xf32>
    %304 = math.rsqrt %303 : vector<8x1xf32>
    %305 = vector.broadcast %304 : vector<8x1xf32> to vector<8x64xf32>
    %306 = arith.mulf %301, %305 : vector<8x64xf32>
    %307 = vector.broadcast %287 : vector<1x64xf32> to vector<8x64xf32>
    %308 = arith.mulf %306, %307 : vector<8x64xf32>
    %309 = vector.broadcast %288 : vector<1x64xf32> to vector<8x64xf32>
    %310 = arith.addf %308, %309 : vector<8x64xf32>
    %c0_140 = arith.constant 0 : index
    %c0_141 = arith.constant 0 : index
    %311 = vector.load %arg17[%c0_140, %c0_141] : memref<64x8xf32, #tpu.memory_space<vmem>>, vector<64x8xf32>
    %cst_142 = arith.constant dense<0.000000e+00> : vector<8x8xf32>
    %312 = tpu.matmul %310, %311, %cst_142 {dimension_numbers = #tpu.dot_dimension_numbers<[1], [0], [0], [1], [0, 0, 1, 1], [], []>} : vector<8x64xf32>, vector<64x8xf32>, vector<8x8xf32> -> vector<8x8xf32>
    %c0_143 = arith.constant 0 : index
    %c0_144 = arith.constant 0 : index
    %313 = vector.load %arg18[%c0_143, %c0_144] : memref<1x8xf32, #tpu.memory_space<vmem>>, vector<1x8xf32>
    %314 = vector.broadcast %313 : vector<1x8xf32> to vector<8x8xf32>
    %315 = arith.addf %312, %314 : vector<8x8xf32>
    %cst_145 = arith.constant dense<0xFF800000> : vector<8xf32>
    %316 = vector.multi_reduction <maximumf>, %315, %cst_145 [1] : vector<8x8xf32> to vector<8xf32>
    %317 = vector.shape_cast %316 : vector<8xf32> to vector<8x1xf32>
    %318 = vector.broadcast %317 : vector<8x1xf32> to vector<8x8xf32>
    %319 = arith.subf %315, %318 : vector<8x8xf32>
    %320 = math.exp %319 : vector<8x8xf32>
    %cst_146 = arith.constant dense<0.000000e+00> : vector<8xf32>
    %321 = vector.multi_reduction <add>, %320, %cst_146 [1] : vector<8x8xf32> to vector<8xf32>
    %322 = vector.shape_cast %321 : vector<8xf32> to vector<8x1xf32>
    %323 = vector.broadcast %322 : vector<8x1xf32> to vector<8x8xf32>
    %324 = arith.divf %320, %323 : vector<8x8xf32>
    %c0_147 = arith.constant 0 : index
    %c0_148 = arith.constant 0 : index
    %c0_149 = arith.constant 0 : index
    %325 = vector.load %arg21[%c0_147, %c0_148, %c0_149] : memref<1x8x8xf32, #tpu.memory_space<vmem>>, vector<1x8x8xf32>
    %326 = vector.shape_cast %325 : vector<1x8x8xf32> to vector<8x8xf32>
    %327 = vector.shape_cast %324 : vector<8x8xf32> to vector<1x8x8xf32>
    tpu.vector_store %arg21[%c0_147, %c0_148, %c0_149], %327 {strides = array<i32>} : memref<1x8x8xf32, #tpu.memory_space<vmem>>, vector<1x8x8xf32>,
    %c0_150 = arith.constant 0 : index
    %c0_151 = arith.constant 0 : index
    %328 = vector.load %arg19[%c0_150, %c0_151] : memref<64x32xf32, #tpu.memory_space<vmem>>, vector<64x32xf32>
    %cst_152 = arith.constant dense<0.000000e+00> : vector<8x32xf32>
    %329 = tpu.matmul %310, %328, %cst_152 {dimension_numbers = #tpu.dot_dimension_numbers<[1], [0], [0], [1], [0, 0, 1, 1], [], []>} : vector<8x64xf32>, vector<64x32xf32>, vector<8x32xf32> -> vector<8x32xf32>
    %c0_153 = arith.constant 0 : index
    %c0_154 = arith.constant 0 : index
    %330 = vector.load %arg20[%c0_153, %c0_154] : memref<1x32xf32, #tpu.memory_space<vmem>>, vector<1x32xf32>
    %331 = vector.broadcast %330 : vector<1x32xf32> to vector<8x32xf32>
    %332 = arith.addf %329, %331 : vector<8x32xf32>
    %c0_155 = arith.constant 0 : index
    %c0_156 = arith.constant 0 : index
    %c0_157 = arith.constant 0 : index
    %333 = vector.load %arg22[%c0_155, %c0_156, %c0_157] : memref<1x8x32xf32, #tpu.memory_space<vmem>>, vector<1x8x32xf32>
    %334 = vector.shape_cast %333 : vector<1x8x32xf32> to vector<8x32xf32>
    %335 = vector.shape_cast %332 : vector<8x32xf32> to vector<1x8x32xf32>
    tpu.vector_store %arg22[%c0_155, %c0_156, %c0_157], %335 {strides = array<i32>} : memref<1x8x32xf32, #tpu.memory_space<vmem>>, vector<1x8x32xf32>,
    return
  }
  func.func @transform_0(%arg0: i32) -> (i32, i32, i32) {
    %c0_i32 = arith.constant 0 : i32
    %c0_i32_0 = arith.constant 0 : i32
    %c0_i32_1 = arith.constant 0 : i32
    return %arg0, %c0_i32, %c0_i32_0 : i32, i32, i32
  }
  func.func @transform_1(%arg0: i32) -> (i32, i32) {
    %c0_i32 = arith.constant 0 : i32
    %c0_i32_0 = arith.constant 0 : i32
    %c0_i32_1 = arith.constant 0 : i32
    return %c0_i32, %c0_i32_0 : i32, i32
  }
  func.func @transform_2(%arg0: i32) -> (i32, i32) {
    %c0_i32 = arith.constant 0 : i32
    %c0_i32_0 = arith.constant 0 : i32
    %c0_i32_1 = arith.constant 0 : i32
    return %c0_i32, %c0_i32_0 : i32, i32
  }
  func.func @transform_3(%arg0: i32) -> (i32, i32) {
    %c0_i32 = arith.constant 0 : i32
    %c0_i32_0 = arith.constant 0 : i32
    %c0_i32_1 = arith.constant 0 : i32
    return %c0_i32, %c0_i32_0 : i32, i32
  }
  func.func @transform_4(%arg0: i32) -> (i32, i32, i32) {
    %c0_i32 = arith.constant 0 : i32
    %c0_i32_0 = arith.constant 0 : i32
    %c0_i32_1 = arith.constant 0 : i32
    %c0_i32_2 = arith.constant 0 : i32
    return %c0_i32, %c0_i32_0, %c0_i32_1 : i32, i32, i32
  }
  func.func @transform_5(%arg0: i32) -> (i32, i32) {
    %c0_i32 = arith.constant 0 : i32
    %c0_i32_0 = arith.constant 0 : i32
    %c0_i32_1 = arith.constant 0 : i32
    return %c0_i32, %c0_i32_0 : i32, i32
  }
  func.func @transform_6(%arg0: i32) -> (i32, i32, i32) {
    %c0_i32 = arith.constant 0 : i32
    %c0_i32_0 = arith.constant 0 : i32
    %c0_i32_1 = arith.constant 0 : i32
    %c0_i32_2 = arith.constant 0 : i32
    return %c0_i32, %c0_i32_0, %c0_i32_1 : i32, i32, i32
  }
  func.func @transform_7(%arg0: i32) -> (i32, i32) {
    %c0_i32 = arith.constant 0 : i32
    %c0_i32_0 = arith.constant 0 : i32
    %c0_i32_1 = arith.constant 0 : i32
    return %c0_i32, %c0_i32_0 : i32, i32
  }
  func.func @transform_8(%arg0: i32) -> (i32, i32, i32) {
    %c0_i32 = arith.constant 0 : i32
    %c0_i32_0 = arith.constant 0 : i32
    %c0_i32_1 = arith.constant 0 : i32
    %c0_i32_2 = arith.constant 0 : i32
    return %c0_i32, %c0_i32_0, %c0_i32_1 : i32, i32, i32
  }
  func.func @transform_9(%arg0: i32) -> (i32, i32) {
    %c0_i32 = arith.constant 0 : i32
    %c0_i32_0 = arith.constant 0 : i32
    %c0_i32_1 = arith.constant 0 : i32
    return %c0_i32, %c0_i32_0 : i32, i32
  }
  func.func @transform_10(%arg0: i32) -> (i32, i32, i32) {
    %c0_i32 = arith.constant 0 : i32
    %c0_i32_0 = arith.constant 0 : i32
    %c0_i32_1 = arith.constant 0 : i32
    %c0_i32_2 = arith.constant 0 : i32
    return %c0_i32, %c0_i32_0, %c0_i32_1 : i32, i32, i32
  }
  func.func @transform_11(%arg0: i32) -> (i32, i32) {
    %c0_i32 = arith.constant 0 : i32
    %c0_i32_0 = arith.constant 0 : i32
    %c0_i32_1 = arith.constant 0 : i32
    return %c0_i32, %c0_i32_0 : i32, i32
  }
  func.func @transform_12(%arg0: i32) -> (i32, i32) {
    %c0_i32 = arith.constant 0 : i32
    %c0_i32_0 = arith.constant 0 : i32
    %c0_i32_1 = arith.constant 0 : i32
    return %c0_i32, %c0_i32_0 : i32, i32
  }
  func.func @transform_13(%arg0: i32) -> (i32, i32) {
    %c0_i32 = arith.constant 0 : i32
    %c0_i32_0 = arith.constant 0 : i32
    %c0_i32_1 = arith.constant 0 : i32
    return %c0_i32, %c0_i32_0 : i32, i32
  }
  func.func @transform_14(%arg0: i32) -> (i32, i32) {
    %c0_i32 = arith.constant 0 : i32
    %c0_i32_0 = arith.constant 0 : i32
    %c0_i32_1 = arith.constant 0 : i32
    return %c0_i32, %c0_i32_0 : i32, i32
  }
  func.func @transform_15(%arg0: i32) -> (i32, i32) {
    %c0_i32 = arith.constant 0 : i32
    %c0_i32_0 = arith.constant 0 : i32
    %c0_i32_1 = arith.constant 0 : i32
    return %c0_i32, %c0_i32_0 : i32, i32
  }
  func.func @transform_16(%arg0: i32) -> (i32, i32) {
    %c0_i32 = arith.constant 0 : i32
    %c0_i32_0 = arith.constant 0 : i32
    %c0_i32_1 = arith.constant 0 : i32
    return %c0_i32, %c0_i32_0 : i32, i32
  }
  func.func @transform_17(%arg0: i32) -> (i32, i32) {
    %c0_i32 = arith.constant 0 : i32
    %c0_i32_0 = arith.constant 0 : i32
    %c0_i32_1 = arith.constant 0 : i32
    return %c0_i32, %c0_i32_0 : i32, i32
  }
  func.func @transform_18(%arg0: i32) -> (i32, i32) {
    %c0_i32 = arith.constant 0 : i32
    %c0_i32_0 = arith.constant 0 : i32
    %c0_i32_1 = arith.constant 0 : i32
    return %c0_i32, %c0_i32_0 : i32, i32
  }
  func.func @transform_19(%arg0: i32) -> (i32, i32) {
    %c0_i32 = arith.constant 0 : i32
    %c0_i32_0 = arith.constant 0 : i32
    %c0_i32_1 = arith.constant 0 : i32
    return %c0_i32, %c0_i32_0 : i32, i32
  }
  func.func @transform_20(%arg0: i32) -> (i32, i32, i32) {
    %c0_i32 = arith.constant 0 : i32
    %c0_i32_0 = arith.constant 0 : i32
    %c0_i32_1 = arith.constant 0 : i32
    return %arg0, %c0_i32, %c0_i32_0 : i32, i32, i32
  }
  func.func @transform_21(%arg0: i32) -> (i32, i32, i32) {
    %c0_i32 = arith.constant 0 : i32
    %c0_i32_0 = arith.constant 0 : i32
    %c0_i32_1 = arith.constant 0 : i32
    return %arg0, %c0_i32, %c0_i32_0 : i32, i32, i32
  }
}

</mosaic_0001>

<bundles_post_ra>
// kernel: transformer_state_forward.1
= control target key start
LH: loop header
LB: loop body
LE: loop exit
PB: predicated region body
PF: predicated region fallthrough
CT: control target
= control target key end

     0   :  { %s5399_s0 = inlined_call_operand.vmem [shape: f32[2,8,16], index: 0, kind: input, shape index: {}]   ;;  %s5400_s1 = inlined_call_operand.vmem [shape: f32[8,64], index: 1, kind: input, shape index: {}]   ;;  %s5401_s2 = inlined_call_operand.vmem [shape: f32[16,64], index: 2, kind: input, shape index: {}]   ;;  %s5402_s3 = inlined_call_operand.vmem [shape: f32[1,64], index: 3, kind: input, shape index: {}]   ;;  %s5403_s4 = inlined_call_operand.vmem [shape: f32[2,64,192], index: 4, kind: input, shape index: {}]   ;;  %s5404_s5 = inlined_call_operand.vmem [shape: f32[2,192], index: 5, kind: input, shape index: {}]   ;;  %s5405_s6 = inlined_call_operand.vmem [shape: f32[2,64,64], index: 6, kind: input, shape index: {}]   ;;  %s5406_s7 = inlined_call_operand.vmem [shape: f32[2,64], index: 7, kind: input, shape index: {}]   ;;  %s5407_s8 = inlined_call_operand.vmem [shape: f32[2,64,128], index: 8, kind: input, shape index: {}]   ;;  %s5408_s9 = inlined_call_operand.vmem [shape: f32[2,128], index: 9, kind: input, shape index: {}]   ;;  %s5409_s10 = inlined_call_operand.vmem [shape: f32[2,128,64], index: 10, kind: input, shape index: {}]   ;;  %s5410_s11 = inlined_call_operand.vmem [shape: f32[2,64], index: 11, kind: input, shape index: {}]   ;;  %s5411_s12 = inlined_call_operand.vmem [shape: f32[2,64], index: 12, kind: input, shape index: {}]   ;;  %s5412_s13 = inlined_call_operand.vmem [shape: f32[2,64], index: 13, kind: input, shape index: {}]   ;;  %s5413_s14 = inlined_call_operand.vmem [shape: f32[2,64], index: 14, kind: input, shape index: {}]   ;;  %s5414_s15 = inlined_call_operand.vmem [shape: f32[2,64], index: 15, kind: input, shape index: {}]   ;;  %s5415_s16 = inlined_call_operand.vmem [shape: f32[64,8], index: 16, kind: input, shape index: {}]   ;;  %s5416_s17 = inlined_call_operand.vmem [shape: f32[1,8], index: 17, kind: input, shape index: {}]   ;;  %s5417_s18 = inlined_call_operand.vmem [shape: f32[64,32], index: 18, kind: input, shape index: {}]   ;;  %s5418_s19 = inlined_call_operand.vmem [shape: f32[1,32], index: 19, kind: input, shape index: {}]   ;;  %s5419_s20 = inlined_call_operand.hbm [shape: f32[2,8,8], index: 20, kind: output, shape index: {0}]   ;;  %s5420_s21 = inlined_call_operand.vmem [shape: f32[2,8,32], index: 21, kind: output, shape index: {1}]  }
   0x1   :  { %5443 = sst [smem:[#allocation11_spill]] %s5399_s0 }
   0x2   :  { %5444 = sst [smem:[#allocation12_spill]] %s5400_s1 }
   0x3   :  { %5445 = sst [smem:[#allocation13_spill]] %s5401_s2 }
   0x4   :  { %5446 = sst [smem:[#allocation14_spill]] %s5402_s3 }
   0x5   :  { %5447 = sst [smem:[#allocation15_spill]] %s5403_s4 }
   0x6   :  { %5448 = sst [smem:[#allocation16_spill]] %s5404_s5 }
   0x7   :  { %5449 = sst [smem:[#allocation17_spill]] %s5405_s6 }
   0x8   :  { %5450 = sst [smem:[#allocation18_spill]] %s5419_s20 }
   0x9   :  { %27 = vsyncpa [#allocation3], 0 }
   0xa   :  { %29 = vsyncpa [#allocation3 + $0x1], 0  ;;  %s4618_s2 = smov 0   ;;  %s4620_s25 = smov 0  }
   0xb   :  { %s4622_s26 = smov 0   ;;  %s4624_s27 = smov 0  }
   0xc LB: > { %5451 = sst [smem:[#allocation5_spill]] %s4483_s2  ;;  %s4639_s3 = sadd.s32 4294967295, %s4495_s27   ;;  %s4495_s27 = sphi %s4624_s27, %s5478_s27   ;;  %s4491_s26 = sphi %s4622_s26, %s5480_s26   ;;  %s4487_s25 = sphi %s4620_s25, %s5482_s25   ;;  %s4483_s2 = sphi %s4618_s2, %s5481_s2  }
   0xd   : > { %5452 = sst [smem:[#allocation6_spill]] %s4491_s26  ;;  %s3651_s28 = sadd.s32 4294967294, %s4495_s27  }
   0xe   : > { %5453 = sst [smem:[#allocation7_spill]] %s4495_s27  ;;  %s4643_s29 = sadd.s32 1, %s4495_s27  }
   0xf   : > { %5454 = sst [smem:[#allocation8_spill]] %s4643_s29  ;;  %s467_s0 = sadd.s32 1, %s4491_s26 }
  0x10   : > { %s464_s4 = ssub.s32 %s4495_s27, %s4643_s29  ;;  %p477_p0 = scmp.ne.s32.totalorder %s4491_s26, %s4487_s25 }
  0x11   : > { %p465_p1 = scmp.eq.s32.totalorder %s464_s4, 0  ;;  %p478_p2 = scmp.eq.s32.totalorder %s4639_s3, 1 }
  0x12   : > { %p483_p3 = scmp.ne.s32.totalorder %s4487_s25, %s4483_s2  ;;  %p484_p4 = scmp.eq.s32.totalorder %s3651_s28, 1 }
  0x13   : > { %s4654_s30 = scalar_select %p465_p1, %s4491_s26, %s467_s0  }
  0x14   : > { %p4656_p5 = por %p478_p2, %p477_p0  ;;  %p4660_p6 = por %p484_p4, %p483_p3 }
  0x15   : > { %5455 = sst [smem:[#allocation9_spill]] %s4654_s30  ;;  %p3654_p7 = scmp.ge.s32.totalorder %s4495_s27, 1 }
  0x16   : > { %s5457_s22 = scalar_select %p4660_p6, 1, 0 }
  0x17   : > { %p592_p8 = scmp.lt.s32.totalorder %s4495_s27, 3 }
  0x18   : > { %5458 = sst [smem:[#allocation10_spill]] %s5457_s22 }
  0x19   : > { %p593_p9 = pnand %p3654_p7, %p592_p8 }
  0x1a   : > { %s5459_s24 = sld [smem:[#allocation13_spill]] (!%p593_p9)  ;;  %p655_p10 = scmp.lt.s32.totalorder (!%p593_p9), %s4639_s3, 1  ;;  %v4497_v2 = vmov (!%p593_p9), 0.0|0.0   ;;  %vm4498_vm0 = vmmov (!%p593_p9), 0   ;;  %v4499_v4 = vmov (!%p593_p9), 0.0   ;;  %vm673_vm1 = vcmask (!%p593_p9), 130048  }
  0x1b   : > { %596 = sbr.rel (%p593_p9) target bundleno = 8063 (0x1f7f), region = 100  ;;  %4185 = vmatprep.subr.bf16.mxu0 (!%p593_p9), %v4497_v2  ;;  %3900 = vmatprep.mubr.msk.f32.mxu0 (!%p593_p9), %vm4498_vm0, %v4499_v4  ;;  %s5460_s23 = sld [smem:[#allocation15_spill]] (!%p593_p9)  ;;  %vm778_vm2 = vcmask (!%p593_p9), 523264   ;;  %v768_v37 = vlaneseq (!%p593_p9)  ;;  %vm939_vm3 = vcmask (!%p593_p9), 64512   ;;  %vm3545_vm4 = vcmask (!%p593_p9), 261120  }
  0x1c   : > { %846 = vmatprep.mubr.f32.mxu1 (!%p593_p9), %v4499_v4  ;;  %s5461_s27 = sld [smem:[#allocation11_spill]] (!%p593_p9)  ;;  %s5463_s26 = sld [smem:[#allocation12_spill]] (!%p593_p9) }
  0x1d   : > { %v4751_v38 = vshrl.u32 (!%p593_p9), %v768_v37, 7  ;;  %s5464_s29 = sld [smem:[#allocation16_spill]] (!%p593_p9)  ;;  %s5438_s22 = smov (!%p593_p9), 48  }
  0x1e   : > { %s5442_s0 = smov (!%p593_p9), 64   ;;  %s5434_s2 = smov (!%p593_p9), 112  }
  0x1f   : > { %v770_v39 = vsub.s32 (!%p593_p9), 0, %v4751_v38  ;;  %v774_v45 = vsub.s32 (!%p593_p9), 1, %v4751_v38  ;;  %s5440_s4 = smov (!%p593_p9), 80   ;;  %s5465_s6 = sld [smem:[#allocation17_spill]] (!%p593_p9) }
  0x20   : > { %v664_v0 = vld [vmem:[%s5459_s24] sm:$0xff] (!%p593_p9)  ;;  %v665_v1 = vld [vmem:[%s5459_s24 + $0x8] sm:$0xff] (!%p593_p9) }
  0x21   : > { %v4186_v3 = vpack.c.bf16 (!%p593_p9), %v665_v1, %v664_v0  ;;  %v751_v5 = vld [vmem:[%s5460_s23 + $0x8] sm:$0xff] (!%p593_p9)  ;;  %v753_v6 = vld [vmem:[%s5460_s23 + $0x18] sm:$0xff] (!%p593_p9)  ;;  %v750_v7 = vld [vmem:[%s5460_s23] sm:$0xff] (!%p593_p9) }
  0x22   : > { %s4686_s24 = scalar_select %p655_p10, %s4639_s3, 1  ;;  %v4188_v8 = vpack.c.bf16 %v753_v6, %v751_v5  ;;  %v752_v9 = vld [vmem:[%s5460_s23 + $0x10] sm:$0xff]  ;;  %v755_v10 = vld [vmem:[%s5460_s23 + $0x28] sm:$0xff]  ;;  %v757_v11 = vld [vmem:[%s5460_s23 + $0x38] sm:$0xff] }
  0x23   : > { %4187 = vmatpush3.bf16.msra.mxu0 %v4186_v3  ;;  %v4190_v12 = vpack.c.bf16 %v752_v9, %v750_v7  ;;  %v4192_v13 = vpack.c.bf16 %v757_v11, %v755_v10  ;;  %v754_v14 = vld [vmem:[%s5460_s23 + $0x20] sm:$0xff]  ;;  %v756_v15 = vld [vmem:[%s5460_s23 + $0x30] sm:$0xff]  ;;  %v759_v16 = vld [vmem:[%s5460_s23 + $0x48] sm:$0xff] }
  0x24   : > { %s5432_s30 = sshll.u32 %s4686_s24, 3  ;;  %4189 = vmatprep.subr.bf16.mxu1 %v4188_v8  ;;  %v761_v17 = vld [vmem:[%s5460_s23 + $0x58] sm:$0xff]  ;;  %3903 = vmatprep.subr.mxu0 %v4499_v4  ;;  %v4194_v18 = vpack.c.bf16 %v756_v15, %v754_v14  ;;  %v758_v21 = vld [vmem:[%s5460_s23 + $0x40] sm:$0xff]  ;;  %v760_v22 = vld [vmem:[%s5460_s23 + $0x50] sm:$0xff] }
  0x25   : > { %s658_s20 = scalar_lea.vmem %s5461_s27, %s5432_s30  ;;  %4191 = vmatpush1.bf16.msra.mxu1 %v4190_v12  ;;  %v4196_v20 = vpack.c.bf16 %v761_v17, %v759_v16  ;;  %v4198_v23 = vpack.c.bf16 %v760_v22, %v758_v21  ;;  %v763_v24 = vld [vmem:[%s5460_s23 + $0x68] sm:$0xff]  ;;  %v765_v25 = vld [vmem:[%s5460_s23 + $0x78] sm:$0xff]  ;;  %v762_v27 = vld [vmem:[%s5460_s23 + $0x60] sm:$0xff]  ;;  %s5436_s27 = smov 96  }
  0x26   : > { %v663_v19 = vld [vmem:[%s658_s20] sm:$0xff]  ;;  %4193 = vmatprep.subr.bf16.mxu1 %v4192_v13  ;;  %v4200_v26 = vpack.c.bf16 %v765_v25, %v763_v24  ;;  %v764_v28 = vld [vmem:[%s5460_s23 + $0x70] sm:$0xff]  ;;  %s5462_s20 = sld [smem:[#allocation14_spill]]  ;;  %s5466_s30 = smov 64  }
  0x27   : > { %3901 = vmatmul.mubr.msk.f32.vlgmr.msra.gmra.mrb[0].mxu0 %vm673_vm1, %v663_v19  ;;  %v4202_v29 = vpack.c.bf16 %v764_v28, %v762_v27  ;;  %v748_v34 = vld [vmem:[%s5463_s26] sm:$0xff]  ;;  %s5439_s26 = smov 16   ;;  %v855_v27 = vld [vmem:[%s5465_s6 + $0x10] sm:$0xff]  ;;  %v856_v28 = vld [vmem:[%s5465_s6 + $0x18] sm:$0xff] }
  0x28   : > { %3905 = vmatprep.mubr.msk.f32.mxu0 %vm4498_vm0, %v4499_v4  ;;  %v766_v40 = vld [vmem:[%s5464_s29] ss:$2 sm:$0x3] }
  0x29   : > { %4195 = vmatpush1.bf16.msra.mxu1 %v4194_v18  ;;  %v771_v41 = vrot.slane %v766_v40, %v770_v39  ;;  %v775_v46 = vrot.slane %v766_v40, %v774_v45 }
  0x2a   : > { %4197 = vmatprep.subr.bf16.mxu1 %v4196_v20 }
  0x2c   : > { %v3658_v30 = vld [vmem:[%s5462_s20] ss:$0 sm:$0xff]  ;;  %s5433_s20 = smov 32  }
  0x2d   : > { %4199 = vmatpush1.bf16.msra.mxu1 %v4198_v23 }
  0x2e   : > { %4201 = vmatprep.subr.bf16.mxu1 %v4200_v26 }
  0x31   : > { %4203 = vmatpush1.bf16.msra.mxu1 %v4202_v29  ;;  %v4205_v29 = vpack.c.bf16 %v856_v28, %v855_v27  ;;  %v1852_v28 = vld [vmem:[%s5407_s8 + $0x10] sm:$0xff] }
  0x32   : > { %3937 = vmatprep.subr.mxu1 %v4499_v4 }
  0xfa   : > { %v743_v31 = vpop.f32.mrb[0].mxu0 }
  0xfb   : > { %v744_v32 = vadd.f32 %v3658_v30, %v743_v31  ;;  %v3902_v33 = vpop.f32.mrb[1].mxu0  ;;  %v853_v31 = vld [vmem:[%s5465_s6] sm:$0xff] }
  0xfd   : > { %v747_v35 = vmul.f32 8.0, %v744_v32  ;;  %v854_v32 = vld [vmem:[%s5465_s6 + $0x8] sm:$0xff] }
  0xfe   : > { %v4208_v33 = vpack.c.bf16 %v854_v32, %v853_v31  ;;  %v1854_v31 = vld [vmem:[%s5407_s8 + $0x20] sm:$0xff]  ;;  %v1855_v32 = vld [vmem:[%s5407_s8 + $0x28] sm:$0xff] }
  0xff   : > { %v4745_v36 = vadd.f32 %v748_v34, %v747_v35 }
 0x101   : > { %3660 = vmatmul.mubr.msk.f32.vlgmr.msra.gmra.mrb[0].mxu1 %vm778_vm2, %v4745_v36 }
 0x102   : > { %3939 = vmatprep.mubr.msk.f32.mxu1 %vm4498_vm0, %v4499_v4 }
 0x1d4   : > { %v848_v42 = vpop.f32.mrb[0].mxu1 }
 0x1d5   : > { %v4759_v43 = vadd.f32 %v848_v42, %v771_v41  ;;  %v850_v44 = vpop.f32.mrb[1].mxu1 }
 0x1d6   : > { %v4770_v48 = vadd.f32 %v850_v44, %v775_v46  ;;  %v857_v44 = vld [vmem:[%s5465_s6 + $0x20] sm:$0xff]  ;;  %v858_v46 = vld [vmem:[%s5465_s6 + $0x28] sm:$0xff] }
 0x1d7   : > { %1026 = vrot.lane.b32.xlu1 %v4759_v43, %s5438_s22  ;;  %862 = vrot.lane.b32.xlu0 %v4759_v43, %s5442_s0  ;;  %s5467_s22 = smov 48   ;;  %s5470_s0 = smov 96  }
 0x249   : > { %v863_v47 = vpop.permute.xlu0 %862  ;;  %v1027_v58 = vpop.permute.xlu1 %1026 }
 0x24a   : > { %3904 = vmatpush3.xpose.msk.msra.mxu0 %vm673_vm1, %v863_v47  ;;  %v4211_v47 = vpack.c.bf16 %v858_v46, %v857_v44  ;;  %v1940_v44 = vld [vmem:[%s5409_s10 + $0x18] sm:$0xff] }
 0x24b   : > { %3908 = vmatprep.subr.mxu0 %v4499_v4 }
 0x24d   : > { %3906 = vmatmul.mubr.msk.f32.vlgmr.msra.gmra.mrb[2].mxu0 %vm673_vm1, %v4759_v43 }
 0x24e   : > { %3909 = vmatpush3.msra.mxu0 %v4770_v48  ;;  %3910 = vmatprep.mubr.msk.f32.mxu0 %vm4498_vm0, %v4499_v4 }
 0x24f   : > { %3913 = vmatprep.subr.mxu0 %v4499_v4 }
 0x320   : > { %v934_v49 = vpop.f32.mrb[2].mxu0 }
 0x321   : > { %v938_v50 = vmul.f32 0.25, %v934_v49  ;;  %v3907_v51 = vpop.f32.mrb[3].mxu0 }
 0x323   : > { %v940_v52 = vsel %vm939_vm3, %v938_v50, -inf }
 0x324   : > { %941 = vmax.xlane.f32.xlu0 %v940_v52 }
 0x3b1   : > { %v942_v53 = vpop.xlane.xlu0 %941 }
 0x3b2   : > { %v943_v54 = vsub.f32 %v938_v50, %v942_v53 }
 0x3b4   : > { %v944_v55 = vmul.f32 1.442695, %v943_v54 }
 0x3b6   : > { %4389 = vpow2.f32 %v944_v55 }
 0x3c0   : > { %v4390_v56 = vpop.eup %4389 }
 0x3c1   : > { %v946_v57 = vsel %vm939_vm3, %v4390_v56, 0.0 }
 0x3c2   : > { %947 = vadd.xlane.f32.xlu1 %v946_v57 }
 0x3d3   : > { %1024 = vrot.lane.b32.xlu1 %v4759_v43, %s5434_s2 }
 0x3d7   : > { %1339 = vrot.lane.b32.xlu1 %v4759_v43, %s5433_s20  ;;  %s5469_s20 = smov 32  }
 0x3db   : > { %1337 = vrot.lane.b32.xlu1 %v4759_v43, %s5436_s27 }
 0x44f   : > { %v948_v59 = vpop.xlane.xlu1 %947 }
 0x450   : > { %4391 = vrcp.f32 %v948_v59 }
 0x453   : > { %v1025_v60 = vpop.permute.xlu1 %1024 }
 0x457   : > { %v1340_v61 = vpop.permute.xlu1 %1339 }
 0x458   : > { %3938 = vmatpush3.xpose.msk.msra.mxu1 %vm673_vm1, %v1340_v61 }
 0x459   : > { %4210 = vmatprep.subr.bf16.mxu1 %v4497_v2 }
 0x45a   : > { %v4392_v62 = vpop.eup %4391 }
 0x45b   : > { %v950_v63 = vmul.f32 %v4392_v62, %v4390_v56  ;;  %v1338_v0 = vpop.permute.xlu1 %1337 }
 0x45c   : > { %3940 = vmatmul.mubr.msk.f32.vlgmr.msra.gmra.mrb[2].mxu1 %vm673_vm1, %v1338_v0 }
 0x45d   : > { %3911 = vmatmul.mubr.msk.f32.vlgmr.msra.gmra.mrb[4].mxu0 %vm939_vm3, %v950_v63  ;;  %3951 = vmatprep.mubr.msk.f32.mxu1 %vm4498_vm0, %v4499_v4 }
 0x45e   : > { %3914 = vmatpush3.xpose.msk.msra.mxu0 %vm673_vm1, %v1027_v58  ;;  %3915 = vmatprep.mubr.msk.f32.mxu0 %vm4498_vm0, %v4499_v4 }
 0x45f   : > { %3918 = vmatprep.subr.mxu0 %v4499_v4  ;;  %4212 = vmatpush3.bf16.msra.mxu1 %v4211_v47  ;;  %v1941_v47 = vld [vmem:[%s5409_s10 + $0x20] sm:$0xff] }
 0x460   : > { %3959 = vmatprep.subr.mxu1 %v4499_v4 }
 0x461   : > { %3916 = vmatmul.mubr.msk.f32.vlgmr.msra.gmra.mrb[6].mxu0 %vm673_vm1, %v1025_v60 }
 0x462   : > { %3920 = vmatprep.mubr.msk.f32.mxu0 %vm4498_vm0, %v4499_v4 }
 0x52f   : > { %v1411_v1 = vpop.f32.mrb[2].mxu1 }
 0x530   : > { %v1020_v3 = vpop.f32.mrb[4].mxu0  ;;  %v3941_v5 = vpop.f32.mrb[3].mxu1  ;;  %v1415_v16 = vmul.f32 0.25, %v1411_v1 }
 0x531   : > { %v3912_v6 = vpop.f32.mrb[5].mxu0 }
 0x532   : > { %v1416_v17 = vsel %vm939_vm3, %v1415_v16, -inf }
 0x534   : > { %v1098_v7 = vpop.f32.mrb[6].mxu0 }
 0x535   : > { %v1102_v8 = vmul.f32 0.25, %v1098_v7  ;;  %v3917_v9 = vpop.f32.mrb[7].mxu0 }
 0x537   : > { %v1103_v10 = vsel %vm939_vm3, %v1102_v8, -inf }
 0x538   : > { %1104 = vmax.xlane.f32.xlu1 %v1103_v10 }
 0x5c5   : > { %v1105_v11 = vpop.xlane.xlu1 %1104 }
 0x5c6   : > { %v1106_v12 = vsub.f32 %v1102_v8, %v1105_v11 }
 0x5c8   : > { %v1107_v13 = vmul.f32 1.442695, %v1106_v12 }
 0x5ca   : > { %4393 = vpow2.f32 %v1107_v13 }
 0x5d4   : > { %v4394_v14 = vpop.eup %4393 }
 0x5d5   : > { %v1109_v15 = vsel %vm939_vm3, %v4394_v14, 0.0 }
 0x5d6   : > { %1110 = vadd.xlane.f32.xlu0 %v1109_v15  ;;  %v3677_v15 = vld [vmem:[%s5406_s7] ss:$0 sm:$0xff] }
 0x5ec   : > { %1115 = vrot.lane.b32.xlu0 %v4770_v48, %s5434_s2  ;;  %s5468_s2 = smov 112  }
 0x60b   : > { %1417 = vmax.xlane.f32.xlu0 %v1416_v17 }
 0x621   : > { %1577 = vrot.lane.b32.xlu0 %v4759_v43, %s5440_s4 }
 0x663   : > { %v1111_v18 = vpop.xlane.xlu0 %1110 }
 0x664   : > { %4395 = vrcp.f32 %v1111_v18 }
 0x667   : > { %v1116_v19 = vpop.permute.xlu0 %1115 }
 0x668   : > { %3919 = vmatpush3.msra.mxu0 %v1116_v19 }
 0x669   : > { %4204 = vmatprep.subr.bf16.mxu0 %v4497_v2 }
 0x66e   : > { %v4396_v20 = vpop.eup %4395 }
 0x66f   : > { %v1113_v21 = vmul.f32 %v4396_v20, %v4394_v14 }
 0x671   : > { %3921 = vmatmul.mubr.msk.f32.vlgmr.msra.gmra.mrb[8].mxu0 %vm939_vm3, %v1113_v21 }
 0x672   : > { %3927 = vmatprep.mubr.msk.f32.mxu0 %vm4498_vm0, %v4499_v4  ;;  %4206 = vmatpush3.bf16.msra.mxu0 %v4205_v29  ;;  %v1853_v29 = vld [vmem:[%s5407_s8 + $0x18] sm:$0xff] }
 0x673   : > { %4207 = vmatprep.subr.bf16.mxu0 %v4497_v2 }
 0x698   : > { %v1418_v22 = vpop.xlane.xlu0 %1417 }
 0x699   : > { %v1419_v23 = vsub.f32 %v1415_v16, %v1418_v22 }
 0x69b   : > { %v1420_v24 = vmul.f32 1.442695, %v1419_v23 }
 0x69d   : > { %4397 = vpow2.f32 %v1420_v24 }
 0x6a7   : > { %v4398_v25 = vpop.eup %4397 }
 0x6a8   : > { %v1422_v26 = vsel %vm939_vm3, %v4398_v25, 0.0 }
 0x6a9   : > { %1423 = vadd.xlane.f32.xlu1 %v1422_v26  ;;  %v1850_v26 = vld [vmem:[%s5407_s8] sm:$0xff] }
 0x6ba   : > { %1427 = vrot.lane.b32.xlu1 %v4770_v48, %s5436_s27 }
 0x6be   : > { %1579 = vrot.lane.b32.xlu1 %v4759_v43, %s5439_s26  ;;  %v1578_v43 = vpop.permute.xlu0 %1577 }
 0x736   : > { %v1424_v30 = vpop.xlane.xlu1 %1423 }
 0x737   : > { %4399 = vrcp.f32 %v1424_v30  ;;  %v4220_v30 = vpack.c.bf16 %v1853_v29, %v1852_v28  ;;  %v3688_v28 = vld [vmem:[%s5460_s23 + $0x98] sm:$0xff] }
 0x73a   : > { %v1428_v40 = vpop.permute.xlu1 %1427 }
 0x73e   : > { %v1580_v42 = vpop.permute.xlu1 %1579 }
 0x741   : > { %v4400_v37 = vpop.eup %4399 }
 0x742   : > { %v1426_v41 = vmul.f32 %v4400_v37, %v4398_v25 }
 0x744   : > { %v1187_v34 = vpop.f32.mrb[8].mxu0 }
 0x745   : > { %v3922_v35 = vpop.f32.mrb[9].mxu0  ;;  %3928 = vmatmul.mubr.msk.f32.vlgmr.msra.gmra.mrb[10].mxu0 %vm673_vm1, %v1187_v34  ;;  %v1856_v34 = vld [vmem:[%s5407_s8 + $0x30] sm:$0xff] }
 0x746   : > { %4209 = vmatpush3.bf16.msra.mxu0 %v4208_v33  ;;  %3934 = vmatprep.mubr.msk.f32.mxu0 %vm4498_vm0, %v4499_v4  ;;  %v4223_v33 = vpack.c.bf16 %v1855_v32, %v1854_v31  ;;  %v1857_v35 = vld [vmem:[%s5407_s8 + $0x38] sm:$0xff]  ;;  %v3687_v31 = vld [vmem:[%s5460_s23 + $0x90] sm:$0xff] }
 0x747   : > { %3942 = vmatprep.subr.mxu0 %v4499_v4  ;;  %v4226_v37 = vpack.c.bf16 %v1857_v35, %v1856_v34  ;;  %v3692_v34 = vld [vmem:[%s5460_s23 + $0xb8] sm:$0xff] }
 0x749   : > { %3935 = vmatmul.mubr.msk.f32.vlgmr.msra.gmra.mrb[12].mxu0 %vm673_vm1, %v1020_v3  ;;  %v859_v3 = vld [vmem:[%s5465_s6 + $0x30] sm:$0xff] }
 0x74a   : > { %3943 = vmatpush3.msra.mxu0 %v1428_v40  ;;  %3944 = vmatprep.mubr.msk.f32.mxu0 %vm4498_vm0, %v4499_v4  ;;  %v1937_v40 = vld [vmem:[%s5409_s10] sm:$0xff] }
 0x74b   : > { %3954 = vmatprep.subr.mxu0 %v4499_v4 }
 0x74d   : > { %3945 = vmatmul.mubr.msk.f32.vlgmr.msra.gmra.mrb[14].mxu0 %vm939_vm3, %v1426_v41  ;;  %v1938_v41 = vld [vmem:[%s5409_s10 + $0x8] sm:$0xff] }
 0x74e   : > { %3956 = vmatprep.mubr.msk.f32.mxu0 %vm4498_vm0, %v4499_v4 }
 0x751   : > { %3955 = vmatpush3.xpose.msk.msra.mxu0 %vm673_vm1, %v1580_v42  ;;  %v1939_v42 = vld [vmem:[%s5409_s10 + $0x10] sm:$0xff] }
 0x752   : > { %4213 = vmatprep.subr.bf16.mxu0 %v4497_v2  ;;  %v4232_v46 = vpack.c.bf16 %v1940_v44, %v1939_v42  ;;  %v3694_v42 = vld [vmem:[%s5460_s23 + $0xc8] sm:$0xff] }
 0x754   : > { %3957 = vmatmul.mubr.msk.f32.vlgmr.msra.gmra.mrb[16].mxu0 %vm673_vm1, %v1578_v43  ;;  %v4229_v43 = vpack.c.bf16 %v1938_v41, %v1937_v40  ;;  %v3691_v40 = vld [vmem:[%s5460_s23 + $0xb0] sm:$0xff] }
 0x755   : > { %3968 = vmatprep.mubr.msk.f32.mxu0 %vm4498_vm0, %v4499_v4 }
 0x818   : > { %v1260_v49 = vpop.f32.mrb[10].mxu0 }
 0x819   : > { %v3929_v50 = vpop.f32.mrb[11].mxu0 }
 0x81c   : > { %v1333_v51 = vpop.f32.mrb[12].mxu0 }
 0x81d   : > { %v1334_v52 = vadd.f32 %v1333_v51, %v1260_v49  ;;  %v3936_v53 = vpop.f32.mrb[13].mxu0  ;;  %v1942_v49 = vld [vmem:[%s5409_s10 + $0x28] sm:$0xff]  ;;  %v1943_v51 = vld [vmem:[%s5409_s10 + $0x30] sm:$0xff] }
 0x81e   : > { %v4235_v50 = vpack.c.bf16 %v1942_v49, %v1941_v47  ;;  %v3695_v47 = vld [vmem:[%s5460_s23 + $0xd0] sm:$0xff] }
 0x820   : > { %v1499_v54 = vpop.f32.mrb[14].mxu0 }
 0x821   : > { %v3946_v55 = vpop.f32.mrb[15].mxu0  ;;  %3952 = vmatmul.mubr.msk.f32.vlgmr.msra.gmra.mrb[4].mxu1 %vm673_vm1, %v1499_v54  ;;  %v1945_v54 = vld [vmem:[%s5409_s10 + $0x40] sm:$0xff] }
 0x822   : > { %3961 = vmatprep.mubr.msk.f32.mxu1 %vm4498_vm0, %v4499_v4  ;;  %v1946_v55 = vld [vmem:[%s5409_s10 + $0x48] sm:$0xff] }
 0x827   : > { %v1651_v56 = vpop.f32.mrb[16].mxu0 }
 0x828   : > { %v1655_v57 = vmul.f32 0.25, %v1651_v56  ;;  %v3958_v58 = vpop.f32.mrb[17].mxu0  ;;  %v4241_v56 = vpack.c.bf16 %v1946_v55, %v1945_v54  ;;  %v3699_v54 = vld [vmem:[%s5460_s23 + $0xf0] sm:$0xff] }
 0x829   : > { %v1948_v58 = vld [vmem:[%s5409_s10 + $0x58] sm:$0xff] }
 0x82a   : > { %v1656_v59 = vsel %vm939_vm3, %v1655_v57, -inf }
 0x82b   : > { %1657 = vmax.xlane.f32.xlu1 %v1656_v59 }
 0x83c   : > { %1667 = vrot.lane.b32.xlu1 %v4770_v48, %s5440_s4  ;;  %v860_v48 = vld [vmem:[%s5465_s6 + $0x38] sm:$0xff]  ;;  %s5472_s4 = smov 80  }
 0x83d   : > { %v4214_v5 = vpack.c.bf16 %v860_v48, %v859_v3  ;;  %v3678_v48 = vld [vmem:[%s5411_s12] ss:$0 sm:$0xff] }
 0x83f   : > { %4215 = vmatpush3.bf16.msra.mxu0 %v4214_v5 }
 0x840   : > { %4228 = vmatprep.subr.bf16.mxu0 %v4497_v2 }
 0x8b8   : > { %v1658_v60 = vpop.xlane.xlu1 %1657 }
 0x8b9   : > { %v1659_v61 = vsub.f32 %v1655_v57, %v1658_v60  ;;  %v1947_v57 = vld [vmem:[%s5409_s10 + $0x50] sm:$0xff]  ;;  %v1949_v60 = vld [vmem:[%s5409_s10 + $0x60] sm:$0xff] }
 0x8ba   : > { %v4244_v59 = vpack.c.bf16 %v1948_v58, %v1947_v57 }
 0x8bb   : > { %v1660_v62 = vmul.f32 1.442695, %v1659_v61  ;;  %v1950_v61 = vld [vmem:[%s5409_s10 + $0x68] sm:$0xff] }
 0x8bc   : > { %v1668_v63 = vpop.permute.xlu1 %1667 }
 0x8bd   : > { %4401 = vpow2.f32 %v1660_v62  ;;  %3960 = vmatpush3.msra.mxu1 %v1668_v63  ;;  %v4247_v62 = vpack.c.bf16 %v1950_v61, %v1949_v60  ;;  %v3683_v60 = vld [vmem:[%s5413_s14] ss:$0 sm:$0xff] }
 0x8be   : > { %4216 = vmatprep.subr.bf16.mxu1 %v4497_v2 }
 0x8c7   : > { %v4402_v0 = vpop.eup %4401 }
 0x8c8   : > { %v1662_v1 = vsel %vm939_vm3, %v4402_v0, 0.0 }
 0x8c9   : > { %1663 = vadd.xlane.f32.xlu0 %v1662_v1 }
 0x8f4   : > { %v1572_v6 = vpop.f32.mrb[4].mxu1 }
 0x8f5   : > { %v1576_v7 = vadd.f32 %v1572_v6, %v1334_v52  ;;  %v3953_v8 = vpop.f32.mrb[5].mxu1  ;;  %v1944_v52 = vld [vmem:[%s5409_s10 + $0x38] sm:$0xff]  ;;  %v3679_v6 = vld [vmem:[%s5412_s13] ss:$0 sm:$0xff] }
 0x8f6   : > { %v4238_v53 = vpack.c.bf16 %v1944_v52, %v1943_v51  ;;  %v3700_v51 = vld [vmem:[%s5460_s23 + $0xf8] sm:$0xff] }
 0x956   : > { %v1664_v9 = vpop.xlane.xlu0 %1663 }
 0x957   : > { %4403 = vrcp.f32 %v1664_v9  ;;  %v1951_v9 = vld [vmem:[%s5409_s10 + $0x70] sm:$0xff] }
 0x961   : > { %v4404_v10 = vpop.eup %4403 }
 0x962   : > { %v1666_v11 = vmul.f32 %v4404_v10, %v4402_v0  ;;  %v1952_v10 = vld [vmem:[%s5409_s10 + $0x78] sm:$0xff] }
 0x964   : > { %3962 = vmatmul.mubr.msk.f32.vlgmr.msra.gmra.mrb[6].mxu1 %vm939_vm3, %v1666_v11  ;;  %v4250_v11 = vpack.c.bf16 %v1952_v10, %v1951_v9 }
 0x965   : > { %3987 = vmatprep.mubr.msk.f32.mxu1 %vm4498_vm0, %v4499_v4 }
 0xa37   : > { %v1739_v12 = vpop.f32.mrb[6].mxu1 }
 0xa38   : > { %v3963_v13 = vpop.f32.mrb[7].mxu1  ;;  %3969 = vmatmul.mubr.msk.f32.vlgmr.msra.gmra.mrb[18].mxu0 %vm673_vm1, %v1739_v12  ;;  %v3680_v12 = vld [vmem:[%s5408_s9] ss:$0 sm:$0xff] }
 0xa39   : > { %4022 = vmatprep.mubr.msk.f32.mxu0 %vm4498_vm0, %v4499_v4  ;;  %4230 = vmatpush3.bf16.msra.mxu0 %v4229_v43  ;;  %v3696_v43 = vld [vmem:[%s5460_s23 + $0xd8] sm:$0xff] }
 0xa3a   : > { %4231 = vmatprep.subr.bf16.mxu0 %v4497_v2  ;;  %v4260_v44 = vpack.c.bf16 %v3696_v43, %v3694_v42 }
 0xa3d   : > { %4233 = vmatpush3.bf16.msra.mxu0 %v4232_v46  ;;  %v3693_v46 = vld [vmem:[%s5460_s23 + $0xc0] sm:$0xff] }
 0xa3e   : > { %4234 = vmatprep.subr.bf16.mxu0 %v4497_v2  ;;  %v4262_v49 = vpack.c.bf16 %v3695_v47, %v3693_v46 }
 0xa41   : > { %4236 = vmatpush3.bf16.msra.mxu0 %v4235_v50  ;;  %v3698_v50 = vld [vmem:[%s5460_s23 + $0xe8] sm:$0xff] }
 0xa42   : > { %4237 = vmatprep.subr.bf16.mxu0 %v4497_v2  ;;  %v4264_v52 = vpack.c.bf16 %v3700_v51, %v3698_v50 }
 0xa45   : > { %4239 = vmatpush3.bf16.msra.mxu0 %v4238_v53  ;;  %v3697_v53 = vld [vmem:[%s5460_s23 + $0xe0] sm:$0xff] }
 0xa46   : > { %4240 = vmatprep.subr.bf16.mxu0 %v4497_v2  ;;  %v4266_v55 = vpack.c.bf16 %v3699_v54, %v3697_v53 }
 0xa49   : > { %4242 = vmatpush3.bf16.msra.mxu0 %v4241_v56 }
 0xa4a   : > { %4243 = vmatprep.subr.bf16.mxu0 %v4497_v2 }
 0xa4d   : > { %4245 = vmatpush3.bf16.msra.mxu0 %v4244_v59 }
 0xa4e   : > { %4246 = vmatprep.subr.bf16.mxu0 %v4497_v2 }
 0xa51   : > { %4248 = vmatpush3.bf16.msra.mxu0 %v4247_v62  ;;  %v3684_v62 = vld [vmem:[%s5414_s15] ss:$0 sm:$0xff] }
 0xa52   : > { %4249 = vmatprep.subr.bf16.mxu0 %v4497_v2 }
 0xa55   : > { %4251 = vmatpush3.bf16.msra.mxu0 %v4250_v11 }
 0xa56   : > { %4030 = vmatprep.subr.mxu0 %v4499_v4 }
 0xb0b   : > { %v1812_v14 = vpop.f32.mrb[18].mxu0 }
 0xb0c   : > { %v1816_v16 = vadd.f32 %v1812_v14, %v1576_v7  ;;  %v3970_v17 = vpop.f32.mrb[19].mxu0 }
 0xb0d   : > { %v3682_v17 = vld [vmem:[%s5410_s11] ss:$0 sm:$0xff] }
 0xb0e   : > { %v1822_v18 = vadd.f32 %v3677_v15, %v1816_v16 }
 0xb10   : > { %v1823_v19 = vadd.f32 %v1822_v18, %v4745_v36  ;;  %v1851_v36 = vld [vmem:[%s5407_s8 + $0x8] sm:$0xff] }
 0xb11   : > { %v4217_v27 = vpack.c.bf16 %v1851_v36, %v1850_v26 }
 0xb12   : > { %v1826_v20 = vsel %vm778_vm2, %v1823_v19, 0.0 }
 0xb13   : > { %1827 = vadd.xlane.f32.xlu0 %v1826_v20  ;;  %4218 = vmatpush3.bf16.msra.mxu1 %v4217_v27  ;;  %v3686_v27 = vld [vmem:[%s5460_s23 + $0x88] sm:$0xff] }
 0xb14   : > { %4219 = vmatprep.subr.bf16.mxu1 %v4497_v2  ;;  %v4252_v29 = vpack.c.bf16 %v3688_v28, %v3686_v27  ;;  %v3706_v27 = vld [vmem:[%s5465_s6 + $0x58] sm:$0xff] }
 0xb17   : > { %4221 = vmatpush3.bf16.msra.mxu1 %v4220_v30  ;;  %v3685_v30 = vld [vmem:[%s5460_s23 + $0x80] sm:$0xff] }
 0xb18   : > { %4222 = vmatprep.subr.bf16.mxu1 %v4497_v2  ;;  %v4254_v32 = vpack.c.bf16 %v3687_v31, %v3685_v30 }
 0xb1b   : > { %4224 = vmatpush3.bf16.msra.mxu1 %v4223_v33  ;;  %v3690_v33 = vld [vmem:[%s5460_s23 + $0xa8] sm:$0xff] }
 0xb1c   : > { %4225 = vmatprep.subr.bf16.mxu1 %v4497_v2  ;;  %v4256_v35 = vpack.c.bf16 %v3692_v34, %v3690_v33  ;;  %v3703_v33 = vld [vmem:[%s5465_s6 + $0x40] sm:$0xff]  ;;  %v3704_v34 = vld [vmem:[%s5465_s6 + $0x48] sm:$0xff] }
 0xb1f   : > { %4227 = vmatpush3.bf16.msra.mxu1 %v4226_v37  ;;  %v3689_v37 = vld [vmem:[%s5460_s23 + $0xa0] sm:$0xff] }
 0xb20   : > { %4253 = vmatprep.subr.bf16.mxu1 %v4252_v29  ;;  %v4258_v41 = vpack.c.bf16 %v3691_v40, %v3689_v37  ;;  %v4272_v40 = vpack.c.bf16 %v3704_v34, %v3703_v33 }
 0xba0   : > { %v1828_v21 = vpop.xlane.xlu0 %1827 }
 0xba1   : > { %v1830_v22 = vmul.f32 0.015625, %v1828_v21 }
 0xba3   : > { %v4877_v23 = vsub.f32 %v1823_v19, %v1830_v22 }
 0xba5   : > { %v1832_v24 = vmul.f32 %v4877_v23, %v4877_v23 }
 0xba7   : > { %v1833_v25 = vsel %vm778_vm2, %v1832_v24, 0.0 }
 0xba8   : > { %1834 = vadd.xlane.f32.xlu1 %v1833_v25 }
 0xc35   : > { %v1835_v63 = vpop.xlane.xlu1 %1834 }
 0xc36   : > { %v1836_v0 = vmul.f32 0.015625, %v1835_v63 }
 0xc38   : > { %v1837_v1 = vadd.f32 1e-05, %v1836_v0 }
 0xc3a   : > { %4405 = vrsqrt.f32 %v1837_v1  ;;  %v3701_v1 = vld [vmem:[%s5464_s29 + $0x1] ss:$2 sm:$0x3] }
 0xc44   : > { %v4406_v3 = vpop.eup %4405 }
 0xc45   : > { %v1839_v5 = vmul.f32 %v4406_v3, %v4877_v23  ;;  %v2077_v3 = vrot.slane %v3701_v1, %v770_v39 }
 0xc47   : > { %v1844_v7 = vmul.f32 %v3678_v48, %v1839_v5  ;;  %v2081_v48 = vrot.slane %v3701_v1, %v774_v45 }
 0xc49   : > { %v1849_v8 = vadd.f32 %v3679_v6, %v1844_v7 }
 0xc4b   : > { %3988 = vmatmul.mubr.msk.f32.vlgmr.msra.gmra.mrb[8].mxu1 %vm778_vm2, %v1849_v8 }
 0xc4c   : > { %2151 = vmatprep.mubr.f32.mxu1 %v4499_v4  ;;  %4255 = vmatpush1.bf16.msra.mxu1 %v4254_v32 }
 0xc4d   : > { %4257 = vmatprep.subr.bf16.mxu1 %v4256_v35 }
 0xc50   : > { %4259 = vmatpush1.bf16.msra.mxu1 %v4258_v41 }
 0xc51   : > { %4261 = vmatprep.subr.bf16.mxu1 %v4260_v44 }
 0xc54   : > { %4263 = vmatpush1.bf16.msra.mxu1 %v4262_v49 }
 0xc55   : > { %4265 = vmatprep.subr.bf16.mxu1 %v4264_v52 }
 0xc58   : > { %4267 = vmatpush1.bf16.msra.mxu1 %v4266_v55 }
 0xc59   : > { %4025 = vmatprep.subr.mxu1 %v4499_v4 }
 0xd1e   : > { %v1932_v13 = vpop.f32.mrb[8].mxu1 }
 0xd1f   : > { %v1933_v14 = vadd.f32 %v3680_v12, %v1932_v13  ;;  %v3989_v15 = vpop.f32.mrb[9].mxu1 }
 0xd21   : > { %v1936_v16 = vmax.f32 %v1933_v14, 0.0 }
 0xd23   : > { %4023 = vmatmul.mubr.f32.vlgmr.msra.gmra.mrb[20].mxu0 %v1936_v16 }
 0xd24   : > { %4032 = vmatprep.mubr.msk.f32.mxu0 %vm4498_vm0, %v4499_v4 }
 0xdf6   : > { %v2024_v18 = vpop.f32.mrb[20].mxu0 }
 0xdf7   : > { %v2025_v19 = vadd.f32 %v3682_v17, %v2024_v18  ;;  %v4024_v20 = vpop.f32.mrb[21].mxu0 }
 0xdf9   : > { %v2028_v21 = vadd.f32 %v2025_v19, %v1849_v8 }
 0xdfb   : > { %v2031_v22 = vsel %vm778_vm2, %v2028_v21, 0.0 }
 0xdfc   : > { %2032 = vadd.xlane.f32.xlu0 %v2031_v22 }
 0xe89   : > { %v2033_v23 = vpop.xlane.xlu0 %2032 }
 0xe8a   : > { %v2034_v24 = vmul.f32 0.015625, %v2033_v23 }
 0xe8c   : > { %v2035_v25 = vsub.f32 %v2028_v21, %v2034_v24 }
 0xe8e   : > { %v2036_v26 = vmul.f32 %v2035_v25, %v2035_v25 }
 0xe90   : > { %v2037_v36 = vsel %vm778_vm2, %v2036_v26, 0.0 }
 0xe91   : > { %2038 = vadd.xlane.f32.xlu0 %v2037_v36  ;;  %v3705_v36 = vld [vmem:[%s5465_s6 + $0x50] sm:$0xff] }
 0xe92   : > { %v4269_v28 = vpack.c.bf16 %v3706_v27, %v3705_v36 }
 0xf1e   : > { %v2039_v56 = vpop.xlane.xlu0 %2038 }
 0xf1f   : > { %v2040_v57 = vmul.f32 0.015625, %v2039_v56 }
 0xf21   : > { %v2041_v58 = vadd.f32 1e-05, %v2040_v57 }
 0xf23   : > { %4407 = vrsqrt.f32 %v2041_v58 }
 0xf2d   : > { %v4408_v59 = vpop.eup %4407 }
 0xf2e   : > { %v2043_v61 = vmul.f32 %v4408_v59, %v2035_v25 }
 0xf30   : > { %v2048_v63 = vmul.f32 %v3683_v60, %v2043_v61 }
 0xf32   : > { %v5039_v0 = vadd.f32 %v3684_v62, %v2048_v63 }
 0xf34   : > { %3702 = vmatmul.mubr.msk.f32.vlgmr.msra.gmra.mrb[10].mxu1 %vm778_vm2, %v5039_v0 }
 0xf35   : > { %4027 = vmatprep.mubr.msk.f32.mxu1 %vm4498_vm0, %v4499_v4 }
0x1007   : > { %v2153_v5 = vpop.f32.mrb[10].mxu1 }
0x1008   : > { %v5052_v6 = vadd.f32 %v2153_v5, %v2077_v3  ;;  %v2155_v7 = vpop.f32.mrb[11].mxu1  ;;  %v3707_v3 = vld [vmem:[%s5465_s6 + $0x60] sm:$0xff] }
0x1009   : > { %v5054_v8 = vadd.f32 %v2155_v7, %v2081_v48  ;;  %v3708_v48 = vld [vmem:[%s5465_s6 + $0x68] sm:$0xff] }
0x100a   : > { %2168 = vrot.lane.b32.xlu0 %v5052_v6, %s5466_s30  ;;  %v4275_v5 = vpack.c.bf16 %v3708_v48, %v3707_v3  ;;  %v3745_v3 = vld [vmem:[%s5409_s10 + $0xa8] sm:$0xff] }
0x100b   : > { %4031 = vmatpush3.msra.mxu0 %v5054_v8 }
0x100c   : > { %4040 = vmatprep.subr.mxu0 %v4499_v4 }
0x100e   : > { %2331 = vrot.lane.b32.xlu0 %v5052_v6, %s5467_s22  ;;  %s5473_s22 = sshll.u32 %s4686_s24, 3  ;;  %s646_s24 = sand.u32 1, %s4487_s25  }
0x100f   : > { %s3655_s27 = sshll.u32 %s646_s24, 3 }
0x1010   : > { %s648_s26 = scalar_lea.vmem [#allocation2], %s3655_s27 }
0x1011   : > { %s3565_s1 = sshll.u32 %s648_s26, 4  ;;  %s5358_s1 = int_to_ptr.vmem [resolvable:$true] %s3565_s1 }
0x1012   : > { %2329 = vrot.lane.b32.xlu0 %v5052_v6, %s5468_s2 }
0x107c   : > { %v2169_v38 = vpop.permute.xlu0 %2168 }
0x107d   : > { %4026 = vmatpush3.xpose.msk.msra.mxu1 %vm673_vm1, %v2169_v38 }
0x107e   : > { %4035 = vmatprep.subr.mxu1 %v4499_v4 }
0x1080   : > { %4028 = vmatmul.mubr.msk.f32.vlgmr.msra.gmra.mrb[12].mxu1 %vm673_vm1, %v5052_v6  ;;  %v2332_v39 = vpop.permute.xlu0 %2331 }
0x1081   : > { %4036 = vmatpush3.xpose.msk.msra.mxu1 %vm673_vm1, %v2332_v39  ;;  %4037 = vmatprep.mubr.msk.f32.mxu1 %vm4498_vm0, %v4499_v4 }
0x1082   : > { %4268 = vmatprep.subr.bf16.mxu1 %v4497_v2 }
0x1084   : > { %v2330_v45 = vpop.permute.xlu0 %2329 }
0x1085   : > { %4038 = vmatmul.mubr.msk.f32.vlgmr.msra.gmra.mrb[14].mxu1 %vm673_vm1, %v2330_v45 }
0x1086   : > { %4049 = vmatprep.mubr.msk.f32.mxu1 %vm4498_vm0, %v4499_v4  ;;  %4270 = vmatpush3.bf16.msra.mxu1 %v4269_v28 }
0x1087   : > { %4059 = vmatprep.subr.mxu1 %v4499_v4 }
0x1153   : > { %v2240_v9 = vpop.f32.mrb[12].mxu1 }
0x1154   : > { %v2244_v10 = vmul.f32 0.25, %v2240_v9  ;;  %v4029_v11 = vpop.f32.mrb[13].mxu1 }
0x1156   : > { %v2245_v12 = vsel %vm939_vm3, %v2244_v10, -inf }
0x1157   : > { %2246 = vmax.xlane.f32.xlu1 %v2245_v12 }
0x1158   : > { %v2403_v13 = vpop.f32.mrb[14].mxu1 }
0x1159   : > { %v2407_v14 = vmul.f32 0.25, %v2403_v13  ;;  %v4039_v15 = vpop.f32.mrb[15].mxu1 }
0x115b   : > { %v2408_v16 = vsel %vm939_vm3, %v2407_v14, -inf }
0x115c   : > { %2409 = vmax.xlane.f32.xlu0 %v2408_v16 }
0x11e4   : > { %v2247_v17 = vpop.xlane.xlu1 %2246 }
0x11e5   : > { %v2248_v18 = vsub.f32 %v2244_v10, %v2247_v17 }
0x11e7   : > { %v2249_v19 = vmul.f32 1.442695, %v2248_v18 }
0x11e9   : > { %4409 = vpow2.f32 %v2249_v19  ;;  %v2410_v20 = vpop.xlane.xlu0 %2409 }
0x11ea   : > { %v2411_v21 = vsub.f32 %v2407_v14, %v2410_v20  ;;  %v3709_v20 = vld [vmem:[%s5465_s6 + $0x70] sm:$0xff] }
0x11ec   : > { %v2412_v22 = vmul.f32 1.442695, %v2411_v21  ;;  %v3710_v21 = vld [vmem:[%s5465_s6 + $0x78] sm:$0xff] }
0x11ee   : > { %4411 = vpow2.f32 %v2412_v22  ;;  %v4278_v22 = vpack.c.bf16 %v3710_v21, %v3709_v20  ;;  %v3729_v21 = vld [vmem:[%s5412_s13 + $0x1] ss:$0 sm:$0xff] }
0x11f3   : > { %v4410_v23 = vpop.eup %4409 }
0x11f4   : > { %v2251_v24 = vsel %vm939_vm3, %v4410_v23, 0.0 }
0x11f5   : > { %2252 = vadd.xlane.f32.xlu1 %v2251_v24 }
0x11f8   : > { %v4412_v25 = vpop.eup %4411 }
0x11f9   : > { %v2414_v26 = vsel %vm939_vm3, %v4412_v25, 0.0 }
0x11fa   : > { %2415 = vadd.xlane.f32.xlu1 %v2414_v26 }
0x120b   : > { %2420 = vrot.lane.b32.xlu1 %v5054_v8, %s5468_s2 }
0x120f   : > { %2644 = vrot.lane.b32.xlu1 %v5052_v6, %s5469_s20  ;;  %s5471_s20 = smov 16  }
0x1213   : > { %2642 = vrot.lane.b32.xlu1 %v5052_v6, %s5470_s0 }
0x1282   : > { %v2253_v29 = vpop.xlane.xlu1 %2252 }
0x1283   : > { %4413 = vrcp.f32 %v2253_v29 }
0x1287   : > { %v2416_v30 = vpop.xlane.xlu1 %2415 }
0x1288   : > { %4415 = vrcp.f32 %v2416_v30 }
0x128b   : > { %v2421_v35 = vpop.permute.xlu1 %2420 }
0x128d   : > { %v4414_v31 = vpop.eup %4413 }
0x128e   : > { %v2255_v32 = vmul.f32 %v4414_v31, %v4410_v23  ;;  %v3727_v31 = vld [vmem:[%s5406_s7 + $0x1] ss:$0 sm:$0xff] }
0x128f   : > { %v2645_v44 = vpop.permute.xlu1 %2644 }
0x1290   : > { %4033 = vmatmul.mubr.msk.f32.vlgmr.msra.gmra.mrb[22].mxu0 %vm939_vm3, %v2255_v32 }
0x1291   : > { %4041 = vmatpush3.msra.mxu0 %v2421_v35  ;;  %4042 = vmatprep.mubr.msk.f32.mxu0 %vm4498_vm0, %v4499_v4 }
0x1292   : > { %v4416_v37 = vpop.eup %4415  ;;  %4271 = vmatprep.subr.bf16.mxu0 %v4497_v2 }
0x1293   : > { %v2418_v41 = vmul.f32 %v4416_v37, %v4412_v25  ;;  %v2643_v49 = vpop.permute.xlu1 %2642 }
0x1295   : > { %4043 = vmatmul.mubr.msk.f32.vlgmr.msra.gmra.mrb[24].mxu0 %vm939_vm3, %v2418_v41 }
0x1296   : > { %4273 = vmatpush3.bf16.msra.mxu0 %v4272_v40  ;;  %4056 = vmatprep.mubr.msk.f32.mxu0 %vm4498_vm0, %v4499_v4 }
0x1297   : > { %4064 = vmatprep.subr.mxu0 %v4499_v4 }
0x1363   : > { %v2325_v42 = vpop.f32.mrb[22].mxu0 }
0x1364   : > { %v4034_v43 = vpop.f32.mrb[23].mxu0  ;;  %4057 = vmatmul.mubr.msk.f32.vlgmr.msra.gmra.mrb[26].mxu0 %vm673_vm1, %v2325_v42 }
0x1365   : > { %4066 = vmatprep.mubr.msk.f32.mxu0 %vm4498_vm0, %v4499_v4 }
0x1368   : > { %v2492_v46 = vpop.f32.mrb[24].mxu0 }
0x1369   : > { %v4044_v47 = vpop.f32.mrb[25].mxu0  ;;  %4050 = vmatmul.mubr.msk.f32.vlgmr.msra.gmra.mrb[16].mxu1 %vm673_vm1, %v2492_v46  ;;  %v3730_v46 = vld [vmem:[%s5407_s8 + $0x40] sm:$0xff] }
0x136a   : > { %4060 = vmatpush3.xpose.msk.msra.mxu1 %vm673_vm1, %v2645_v44  ;;  %4061 = vmatprep.mubr.msk.f32.mxu1 %vm4498_vm0, %v4499_v4 }
0x136b   : > { %4274 = vmatprep.subr.bf16.mxu1 %v4497_v2 }
0x136d   : > { %4062 = vmatmul.mubr.msk.f32.vlgmr.msra.gmra.mrb[18].mxu1 %vm673_vm1, %v2643_v49  ;;  %v3732_v49 = vld [vmem:[%s5407_s8 + $0x50] sm:$0xff] }
0x136e   : > { %4073 = vmatprep.mubr.msk.f32.mxu1 %vm4498_vm0, %v4499_v4  ;;  %4276 = vmatpush3.bf16.msra.mxu1 %v4275_v5  ;;  %v3746_v5 = vld [vmem:[%s5409_s10 + $0xb0] sm:$0xff] }
0x136f   : > { %4081 = vmatprep.subr.mxu1 %v4499_v4 }
0x1437   : > { %v2638_v50 = vpop.f32.mrb[26].mxu0 }
0x1438   : > { %v4058_v51 = vpop.f32.mrb[27].mxu0 }
0x143c   : > { %v2565_v52 = vpop.f32.mrb[16].mxu1 }
0x143d   : > { %v2639_v53 = vadd.f32 %v2638_v50, %v2565_v52  ;;  %v4051_v54 = vpop.f32.mrb[17].mxu1  ;;  %v3733_v50 = vld [vmem:[%s5407_s8 + $0x58] sm:$0xff]  ;;  %v3734_v52 = vld [vmem:[%s5407_s8 + $0x60] sm:$0xff] }
0x143e   : > { %v4284_v51 = vpack.c.bf16 %v3733_v50, %v3732_v49  ;;  %v3363_v49 = vld [vmem:[%s5415_s16 + $0x18] sm:$0xff] }
0x1440   : > { %v2716_v55 = vpop.f32.mrb[18].mxu1 }
0x1441   : > { %v2720_v56 = vmul.f32 0.25, %v2716_v55  ;;  %v4063_v57 = vpop.f32.mrb[19].mxu1  ;;  %v3736_v55 = vld [vmem:[%s5407_s8 + $0x70] sm:$0xff] }
0x1443   : > { %v2721_v58 = vsel %vm939_vm3, %v2720_v56, -inf }
0x1444   : > { %2722 = vmax.xlane.f32.xlu0 %v2721_v58  ;;  %v3740_v58 = vld [vmem:[%s5409_s10 + $0x80] sm:$0xff] }
0x145a   : > { %2732 = vrot.lane.b32.xlu0 %v5054_v8, %s5470_s0  ;;  %s3764_s0 = sshll.u32 %s4639_s3, 7  ;;  %s4507_s3 = smov [#allocation2]  }
0x145b   : > { %s4437_s27 = sshll.u32 %s4507_s3, 4  ;;  %s4438_s27 = int_to_ptr.vmem [resolvable:$false] %s4437_s27 }
0x145c   : > { %s4439_s6 = scalar_lea.vmem %s4438_s27, 256  ;;  %p4440_p0 = scmp.lt.s32.totalorder %s5358_s1, %s4438_s27 }
0x145e   : > { %2884 = vrot.lane.b32.xlu0 %v5052_v6, %s5471_s20  ;;  %s3548_s20 = scalar_lea.sflag [#allocation3], %s646_s24 }
0x1462   : > { %2882 = vrot.lane.b32.xlu0 %v5052_v6, %s5472_s4 }
0x14d1   : > { %v2723_v59 = vpop.xlane.xlu0 %2722 }
0x14d2   : > { %v2724_v60 = vsub.f32 %v2720_v56, %v2723_v59  ;;  %v3737_v56 = vld [vmem:[%s5407_s8 + $0x78] sm:$0xff]  ;;  %v3741_v59 = vld [vmem:[%s5409_s10 + $0x88] sm:$0xff] }
0x14d3   : > { %v4290_v57 = vpack.c.bf16 %v3737_v56, %v3736_v55  ;;  %v3367_v55 = vld [vmem:[%s5415_s16 + $0x38] sm:$0xff] }
0x14d4   : > { %v2725_v61 = vmul.f32 1.442695, %v2724_v60  ;;  %v3742_v60 = vld [vmem:[%s5409_s10 + $0x90] sm:$0xff] }
0x14d5   : > { %v2733_v62 = vpop.permute.xlu0 %2732 }
0x14d6   : > { %4417 = vpow2.f32 %v2725_v61  ;;  %4065 = vmatpush3.msra.mxu0 %v2733_v62  ;;  %v4293_v61 = vpack.c.bf16 %v3741_v59, %v3740_v58  ;;  %v3743_v62 = vld [vmem:[%s5409_s10 + $0x98] sm:$0xff] }
0x14d7   : > { %4076 = vmatprep.subr.mxu0 %v4499_v4 }
0x14d9   : > { %v2885_v38 = vpop.permute.xlu0 %2884 }
0x14dd   : > { %v2883_v45 = vpop.permute.xlu0 %2882 }
0x14e0   : > { %v4418_v63 = vpop.eup %4417 }
0x14e1   : > { %v2727_v1 = vsel %vm939_vm3, %v4418_v63, 0.0 }
0x14e2   : > { %2728 = vadd.xlane.f32.xlu1 %v2727_v1  ;;  %v3744_v1 = vld [vmem:[%s5409_s10 + $0xa0] sm:$0xff] }
0x14e3   : > { %v4299_v48 = vpack.c.bf16 %v3745_v3, %v3744_v1  ;;  %v3461_v1 = vld [vmem:[%s5417_s18 + $0x8] sm:$0xff]  ;;  %v3758_v3 = vld [vmem:[%s5414_s15 + $0x1] ss:$0 sm:$0xff] }
0x156f   : > { %v2729_v6 = vpop.xlane.xlu1 %2728 }
0x1570   : > { %4419 = vrcp.f32 %v2729_v6  ;;  %v3747_v6 = vld [vmem:[%s5409_s10 + $0xb8] sm:$0xff] }
0x157a   : > { %v4420_v7 = vpop.eup %4419 }
0x157b   : > { %v2731_v39 = vmul.f32 %v4420_v7, %v4418_v63  ;;  %v4296_v63 = vpack.c.bf16 %v3743_v62, %v3742_v60  ;;  %v4302_v7 = vpack.c.bf16 %v3747_v6, %v3746_v5 }
0x157d   : > { %4067 = vmatmul.mubr.msk.f32.vlgmr.msra.gmra.mrb[28].mxu0 %vm939_vm3, %v2731_v39  ;;  %v3749_v39 = vld [vmem:[%s5409_s10 + $0xc8] sm:$0xff] }
0x157e   : > { %4077 = vmatpush3.xpose.msk.msra.mxu0 %vm673_vm1, %v2885_v38  ;;  %4078 = vmatprep.mubr.msk.f32.mxu0 %vm4498_vm0, %v4499_v4  ;;  %v3748_v38 = vld [vmem:[%s5409_s10 + $0xc0] sm:$0xff] }
0x157f   : > { %4277 = vmatprep.subr.bf16.mxu0 %v4497_v2 }
0x1581   : > { %4079 = vmatmul.mubr.msk.f32.vlgmr.msra.gmra.mrb[30].mxu0 %vm673_vm1, %v2883_v45  ;;  %v4305_v45 = vpack.c.bf16 %v3749_v39, %v3748_v38  ;;  %v3463_v38 = vld [vmem:[%s5417_s18 + $0x18] sm:$0xff] }
0x1582   : > { %4090 = vmatprep.mubr.msk.f32.mxu0 %vm4498_vm0, %v4499_v4  ;;  %4279 = vmatpush3.bf16.msra.mxu0 %v4278_v22 }
0x1583   : > { %4292 = vmatprep.subr.bf16.mxu0 %v4497_v2 }
0x1650   : > { %v2804_v9 = vpop.f32.mrb[28].mxu0 }
0x1651   : > { %v4068_v10 = vpop.f32.mrb[29].mxu0  ;;  %4074 = vmatmul.mubr.msk.f32.vlgmr.msra.gmra.mrb[20].mxu1 %vm673_vm1, %v2804_v9  ;;  %v3750_v9 = vld [vmem:[%s5409_s10 + $0xd0] sm:$0xff] }
0x1652   : > { %4083 = vmatprep.mubr.msk.f32.mxu1 %vm4498_vm0, %v4499_v4  ;;  %v3751_v10 = vld [vmem:[%s5409_s10 + $0xd8] sm:$0xff] }
0x1654   : > { %v2956_v11 = vpop.f32.mrb[30].mxu0 }
0x1655   : > { %v2960_v12 = vmul.f32 0.25, %v2956_v11  ;;  %v4080_v13 = vpop.f32.mrb[31].mxu0  ;;  %v4308_v11 = vpack.c.bf16 %v3751_v10, %v3750_v9  ;;  %v3465_v9 = vld [vmem:[%s5417_s18 + $0x28] sm:$0xff] }
0x1656   : > { %v3753_v13 = vld [vmem:[%s5409_s10 + $0xe8] sm:$0xff] }
0x1657   : > { %v2961_v14 = vsel %vm939_vm3, %v2960_v12, -inf }
0x1658   : > { %2962 = vmax.xlane.f32.xlu0 %v2961_v14 }
0x16e5   : > { %v2963_v15 = vpop.xlane.xlu0 %2962 }
0x16e6   : > { %v2964_v16 = vsub.f32 %v2960_v12, %v2963_v15  ;;  %v3752_v12 = vld [vmem:[%s5409_s10 + $0xe0] sm:$0xff] }
0x16e7   : > { %v4311_v14 = vpack.c.bf16 %v3753_v13, %v3752_v12  ;;  %v3759_v13 = vld [vmem:[%s5416_s17] ss:$0 sm:$0xff] }
0x16e8   : > { %v2965_v17 = vmul.f32 1.442695, %v2964_v16 }
0x16ea   : > { %4421 = vpow2.f32 %v2965_v17 }
0x16f4   : > { %v4422_v18 = vpop.eup %4421 }
0x16f5   : > { %v2967_v19 = vsel %vm939_vm3, %v4422_v18, 0.0 }
0x16f6   : > { %2968 = vadd.xlane.f32.xlu1 %v2967_v19  ;;  %v3728_v19 = vld [vmem:[%s5411_s12 + $0x1] ss:$0 sm:$0xff] }
0x1707   : > { %2972 = vrot.lane.b32.xlu1 %v5054_v8, %s5472_s4  ;;  %s662_s4 = scalar_lea.vmem %s5420_s21, %s5473_s22  ;;  %s5474_s22 = sld [smem:[#allocation18_spill]] }
0x170d   : > { %s5356_s2 = scalar_lea.hbm %s5474_s22, %s3764_s0 }
0x1724   : > { %v2877_v23 = vpop.f32.mrb[20].mxu1 }
0x1725   : > { %v2881_v24 = vadd.f32 %v2877_v23, %v2639_v53  ;;  %v4075_v25 = vpop.f32.mrb[21].mxu1  ;;  %v3735_v53 = vld [vmem:[%s5407_s8 + $0x68] sm:$0xff] }
0x1726   : > { %v4287_v54 = vpack.c.bf16 %v3735_v53, %v3734_v52  ;;  %v3755_v25 = vld [vmem:[%s5409_s10 + $0xf8] sm:$0xff]  ;;  %v3365_v52 = vld [vmem:[%s5415_s16 + $0x28] sm:$0xff] }
0x1783   : > { %v2969_v26 = vpop.xlane.xlu1 %2968 }
0x1784   : > { %4423 = vrcp.f32 %v2969_v26 }
0x1787   : > { %v2973_v36 = vpop.permute.xlu1 %2972 }
0x1788   : > { %4082 = vmatpush3.msra.mxu1 %v2973_v36  ;;  %v3738_v36 = vld [vmem:[%s5408_s9 + $0x1] ss:$0 sm:$0xff] }
0x1789   : > { %4280 = vmatprep.subr.bf16.mxu1 %v4497_v2 }
0x178e   : > { %v4424_v8 = vpop.eup %4423 }
0x178f   : > { %v2971_v27 = vmul.f32 %v4424_v8, %v4422_v18 }
0x1791   : > { %4084 = vmatmul.mubr.msk.f32.vlgmr.msra.gmra.mrb[22].mxu1 %vm939_vm3, %v2971_v27 }
0x1792   : > { %4109 = vmatprep.mubr.msk.f32.mxu1 %vm4498_vm0, %v4499_v4 }
0x1864   : > { %v3044_v28 = vpop.f32.mrb[22].mxu1 }
0x1865   : > { %v4085_v29 = vpop.f32.mrb[23].mxu1  ;;  %4091 = vmatmul.mubr.msk.f32.vlgmr.msra.gmra.mrb[32].mxu0 %vm673_vm1, %v3044_v28 }
0x1866   : > { %4144 = vmatprep.mubr.msk.f32.mxu0 %vm4498_vm0, %v4499_v4  ;;  %4294 = vmatpush3.bf16.msra.mxu0 %v4293_v61  ;;  %v3757_v61 = vld [vmem:[%s5413_s14 + $0x1] ss:$0 sm:$0xff] }
0x1867   : > { %4295 = vmatprep.subr.bf16.mxu0 %v4497_v2 }
0x186a   : > { %4297 = vmatpush3.bf16.msra.mxu0 %v4296_v63  ;;  %v3460_v63 = vld [vmem:[%s5417_s18] sm:$0xff] }
0x186b   : > { %4298 = vmatprep.subr.bf16.mxu0 %v4497_v2  ;;  %v4329_v5 = vpack.c.bf16 %v3461_v1, %v3460_v63 }
0x186e   : > { %4300 = vmatpush3.bf16.msra.mxu0 %v4299_v48 }
0x186f   : > { %4301 = vmatprep.subr.bf16.mxu0 %v4497_v2 }
0x1872   : > { %4303 = vmatpush3.bf16.msra.mxu0 %v4302_v7  ;;  %v3462_v7 = vld [vmem:[%s5417_s18 + $0x10] sm:$0xff] }
0x1873   : > { %4304 = vmatprep.subr.bf16.mxu0 %v4497_v2  ;;  %v4332_v39 = vpack.c.bf16 %v3463_v38, %v3462_v7 }
0x1876   : > { %4306 = vmatpush3.bf16.msra.mxu0 %v4305_v45  ;;  %v3464_v45 = vld [vmem:[%s5417_s18 + $0x20] sm:$0xff] }
0x1877   : > { %4307 = vmatprep.subr.bf16.mxu0 %v4497_v2  ;;  %v4335_v10 = vpack.c.bf16 %v3465_v9, %v3464_v45 }
0x187a   : > { %4309 = vmatpush3.bf16.msra.mxu0 %v4308_v11  ;;  %v3466_v11 = vld [vmem:[%s5417_s18 + $0x30] sm:$0xff] }
0x187b   : > { %4310 = vmatprep.subr.bf16.mxu0 %v4497_v2 }
0x187e   : > { %4312 = vmatpush3.bf16.msra.mxu0 %v4311_v14 }
0x187f   : > { %4313 = vmatprep.subr.bf16.mxu0 %v4497_v2 }
0x1938   : > { %v3117_v30 = vpop.f32.mrb[32].mxu0 }
0x1939   : > { %v3121_v32 = vadd.f32 %v3117_v30, %v2881_v24  ;;  %v4092_v33 = vpop.f32.mrb[33].mxu0  ;;  %v3754_v24 = vld [vmem:[%s5409_s10 + $0xf0] sm:$0xff]  ;;  %v3756_v30 = vld [vmem:[%s5410_s11 + $0x1] ss:$0 sm:$0xff] }
0x193a   : > { %v4314_v26 = vpack.c.bf16 %v3755_v25, %v3754_v24 }
0x193b   : > { %v3127_v34 = vadd.f32 %v3727_v31, %v3121_v32 }
0x193c   : > { %4315 = vmatpush3.bf16.msra.mxu0 %v4314_v26 }
0x193d   : > { %v3128_v35 = vadd.f32 %v3127_v34, %v5039_v0  ;;  %v3731_v0 = vld [vmem:[%s5407_s8 + $0x48] sm:$0xff] }
0x193e   : > { %v4281_v47 = vpack.c.bf16 %v3731_v0, %v3730_v46  ;;  %v3361_v46 = vld [vmem:[%s5415_s16 + $0x8] sm:$0xff] }
0x193f   : > { %v3131_v37 = vsel %vm778_vm2, %v3128_v35, 0.0 }
0x1940   : > { %3132 = vadd.xlane.f32.xlu1 %v3131_v37  ;;  %4282 = vmatpush3.bf16.msra.mxu1 %v4281_v47  ;;  %v3362_v47 = vld [vmem:[%s5415_s16 + $0x10] sm:$0xff] }
0x1941   : > { %4283 = vmatprep.subr.bf16.mxu1 %v4497_v2  ;;  %v4320_v50 = vpack.c.bf16 %v3363_v49, %v3362_v47 }
0x1944   : > { %4285 = vmatpush3.bf16.msra.mxu1 %v4284_v51  ;;  %v3364_v51 = vld [vmem:[%s5415_s16 + $0x20] sm:$0xff] }
0x1945   : > { %4286 = vmatprep.subr.bf16.mxu1 %v4497_v2  ;;  %v4323_v53 = vpack.c.bf16 %v3365_v52, %v3364_v51 }
0x1948   : > { %4288 = vmatpush3.bf16.msra.mxu1 %v4287_v54  ;;  %v3366_v54 = vld [vmem:[%s5415_s16 + $0x30] sm:$0xff] }
0x1949   : > { %4289 = vmatprep.subr.bf16.mxu1 %v4497_v2  ;;  %v4326_v56 = vpack.c.bf16 %v3367_v55, %v3366_v54 }
0x194c   : > { %4291 = vmatpush3.bf16.msra.mxu1 %v4290_v57 }
0x194d   : > { %4316 = vmatprep.subr.bf16.mxu1 %v4497_v2 }
0x19cd   : > { %v3133_v40 = vpop.xlane.xlu1 %3132 }
0x19ce   : > { %v3134_v41 = vmul.f32 0.015625, %v3133_v40 }
0x19d0   : > { %v5167_v42 = vsub.f32 %v3128_v35, %v3134_v41 }
0x19d2   : > { %v3136_v43 = vmul.f32 %v5167_v42, %v5167_v42 }
0x19d4   : > { %v3137_v44 = vsel %vm778_vm2, %v3136_v43, 0.0 }
0x19d5   : > { %3138 = vadd.xlane.f32.xlu0 %v3137_v44  ;;  %v3360_v44 = vld [vmem:[%s5415_s16] sm:$0xff] }
0x19d6   : > { %v4317_v0 = vpack.c.bf16 %v3361_v46, %v3360_v44 }
0x1a62   : > { %v3139_v15 = vpop.xlane.xlu0 %3138 }
0x1a63   : > { %v3140_v16 = vmul.f32 0.015625, %v3139_v15 }
0x1a65   : > { %v3141_v17 = vadd.f32 1e-05, %v3140_v16 }
0x1a67   : > { %4425 = vrsqrt.f32 %v3141_v17 }
0x1a71   : > { %v4426_v18 = vpop.eup %4425 }
0x1a72   : > { %v3143_v20 = vmul.f32 %v4426_v18, %v5167_v42  ;;  %v3761_v18 = vld [vmem:[%s5418_s19] ss:$0 sm:$0xff] }
0x1a74   : > { %v3148_v22 = vmul.f32 %v3728_v19, %v3143_v20 }
0x1a76   : > { %v3153_v23 = vadd.f32 %v3729_v21, %v3148_v22 }
0x1a78   : > { %4110 = vmatmul.mubr.msk.f32.vlgmr.msra.gmra.mrb[24].mxu1 %vm778_vm2, %v3153_v23 }
0x1a79   : > { %4163 = vmatprep.mubr.msk.f32.mxu1 %vm4498_vm0, %v4499_v4  ;;  %4318 = vmatpush3.bf16.msra.mxu1 %v4317_v0 }
0x1a7a   : > { %4319 = vmatprep.subr.bf16.mxu1 %v4497_v2 }
0x1a7d   : > { %4321 = vmatpush3.bf16.msra.mxu1 %v4320_v50 }
0x1a7e   : > { %4322 = vmatprep.subr.bf16.mxu1 %v4497_v2 }
0x1a81   : > { %4324 = vmatpush3.bf16.msra.mxu1 %v4323_v53 }
0x1a82   : > { %4325 = vmatprep.subr.bf16.mxu1 %v4497_v2 }
0x1a85   : > { %4327 = vmatpush3.bf16.msra.mxu1 %v4326_v56 }
0x1a86   : > { %4328 = vmatprep.subr.bf16.mxu1 %v4497_v2 }
0x1b4b   : > { %v3237_v8 = vpop.f32.mrb[24].mxu1 }
0x1b4c   : > { %v3238_v27 = vadd.f32 %v3738_v36, %v3237_v8  ;;  %v4111_v28 = vpop.f32.mrb[25].mxu1 }
0x1b4e   : > { %v3241_v29 = vmax.f32 %v3238_v27, 0.0 }
0x1b50   : > { %4145 = vmatmul.mubr.f32.vlgmr.msra.gmra.mrb[34].mxu0 %v3241_v29 }
0x1c23   : > { %v3330_v31 = vpop.f32.mrb[34].mxu0 }
0x1c24   : > { %v3331_v32 = vadd.f32 %v3756_v30, %v3330_v31  ;;  %v4146_v33 = vpop.f32.mrb[35].mxu0 }
0x1c26   : > { %v3334_v34 = vadd.f32 %v3331_v32, %v3153_v23 }
0x1c28   : > { %v3337_v35 = vsel %vm778_vm2, %v3334_v34, 0.0 }
0x1c29   : > { %3338 = vadd.xlane.f32.xlu0 %v3337_v35 }
0x1cb6   : > { %v3339_v37 = vpop.xlane.xlu0 %3338 }
0x1cb7   : > { %v3340_v40 = vmul.f32 0.015625, %v3339_v37 }
0x1cb9   : > { %v3341_v41 = vsub.f32 %v3334_v34, %v3340_v40 }
0x1cbb   : > { %v3342_v42 = vmul.f32 %v3341_v41, %v3341_v41 }
0x1cbd   : > { %v3343_v43 = vsel %vm778_vm2, %v3342_v42, 0.0 }
0x1cbe   : > { %3344 = vadd.xlane.f32.xlu0 %v3343_v43 }
0x1d4b   : > { %v3345_v57 = vpop.xlane.xlu0 %3344 }
0x1d4c   : > { %v3346_v58 = vmul.f32 0.015625, %v3345_v57 }
0x1d4e   : > { %v3347_v59 = vadd.f32 1e-05, %v3346_v58 }
0x1d50   : > { %4427 = vrsqrt.f32 %v3347_v59 }
0x1d5a   : > { %v4428_v60 = vpop.eup %4427 }
0x1d5b   : > { %v3349_v62 = vmul.f32 %v4428_v60, %v3341_v41 }
0x1d5d   : > { %v3354_v48 = vmul.f32 %v3757_v61, %v3349_v62 }
0x1d5f   : > { %v3359_v6 = vadd.f32 %v3758_v3, %v3354_v48 }
0x1d61   : > { %4164 = vmatmul.mubr.msk.f32.vlgmr.msra.gmra.mrb[26].mxu1 %vm778_vm2, %v3359_v6 }
0x1d62   : > { %4330 = vmatpush3.bf16.msra.mxu1 %v4329_v5  ;;  %4182 = vmatprep.mubr.msk.f32.mxu1 %vm4498_vm0, %v4499_v4  ;;  %v3467_v4 = vld [vmem:[%s5417_s18 + $0x38] sm:$0xff] }
0x1d63   : > { %4331 = vmatprep.subr.bf16.mxu1 %v4497_v2  ;;  %v4338_v12 = vpack.c.bf16 %v3467_v4, %v3466_v11 }
0x1d66   : > { %4333 = vmatpush3.bf16.msra.mxu1 %v4332_v39 }
0x1d67   : > { %4334 = vmatprep.subr.bf16.mxu1 %v4497_v2 }
0x1d6a   : > { %4336 = vmatpush3.bf16.msra.mxu1 %v4335_v10 }
0x1d6b   : > { %4337 = vmatprep.subr.bf16.mxu1 %v4497_v2 }
0x1d6e   : > { %4339 = vmatpush3.bf16.msra.mxu1 %v4338_v12 }
0x1d71   : > { %4183 = vmatmul.mubr.msk.f32.vlgmr.msra.gmra.mrb[28].mxu1 %vm778_vm2, %v3359_v6 }
0x1e34   : > { %v3444_v14 = vpop.f32.mrb[26].mxu1 }
0x1e35   : > { %v3445_v15 = vadd.f32 %v3759_v13, %v3444_v14  ;;  %v4165_v16 = vpop.f32.mrb[27].mxu1 }
0x1e37   : > { %v3448_v17 = vsel %vm939_vm3, %v3445_v15, -inf }
0x1e38   : > { %3449 = vmax.xlane.f32.xlu0 %v3448_v17 }
0x1e44   : > { %v3541_v2 = vpop.f32.mrb[28].mxu1 }
0x1e45   : > { %v3542_v19 = vadd.f32 %v3761_v18, %v3541_v2  ;;  %v4184_v20 = vpop.f32.mrb[29].mxu1 }
0x1e47   : > { %3546 = vst.msk [vmem:[%s662_s4] sm:$0xff] %vm3545_vm4, %v3542_v19  ;;  %s4433_s4 = scalar_lea.vmem %s5358_s1, 128 }
0x1e48   : > { %p4434_p11 = scmp.ne.s32.totalorder %s5358_s1, %s4433_s4  ;;  %p4441_p1 = scmp.lt.s32.totalorder %s4439_s6, %s4433_s4 }
0x1e4a   : > { %p4435_p12 = pnand %p4434_p11, %p4656_p5  ;;  %p4442_p2 = por %p4441_p1, %p4440_p0 }
0x1e4c   : > { %p4436_p13 = pneg %p4435_p12 }
0x1e4e   : > { %p4443_p3 = pnand %p4442_p2, %p4436_p13 }
0x1ec5   : > { %v3450_v21 = vpop.xlane.xlu0 %3449 }
0x1ec6   : > { %v3451_v22 = vsub.f32 %v3445_v15, %v3450_v21 }
0x1ec8   : > { %v3452_v23 = vmul.f32 1.442695, %v3451_v22 }
0x1eca   : > { %4429 = vpow2.f32 %v3452_v23 }
0x1ed4   : > { %v4430_v24 = vpop.eup %4429 }
0x1ed5   : > { %v3454_v25 = vsel %vm939_vm3, %v4430_v24, 0.0 }
0x1ed6   : > { %3455 = vadd.xlane.f32.xlu0 %v3454_v25 }
0x1f63   : > { %v3456_v26 = vpop.xlane.xlu0 %3455 }
0x1f64   : > { %4431 = vrcp.f32 %v3456_v26 }
0x1f6e   : > { %v4432_v36 = vpop.eup %4431 }
0x1f6f   : > { %v3458_v8 = vmul.f32 %v4432_v36, %v4430_v24 }
0x1f71   : > { %3459 = vst.msk [vmem:[%s648_s26] sm:$0xff] %vm939_vm3, %v3458_v8 }
0x1f72   : > { %4446 = shalt.err (!%p4443_p3)
}
0x1f73   : > { %s4447_s24 = scalar_lea.hbm %s5356_s2, 128  ;;  %s4451_s28 = scalar_lea.hbm %s5474_s22, 256 }
0x1f74   : > { %p4448_p4 = scmp.ne.s32.totalorder %s5356_s2, %s4447_s24  ;;  %p4452_p9 = scmp.lt.u32.totalorder %s5356_s2, %s5474_s22 }
0x1f75   : > { %p4453_p10 = scmp.lt.u32.totalorder %s4451_s28, %s4447_s24  ;;  %p4455_p12 = scmp.lt.u32.totalorder %s4447_s24, %s5356_s2 }
0x1f76   : > { %p4449_p7 = pnand %p4448_p4, %p4656_p5 }
0x1f77   : > { %p4454_p11 = por %p4453_p10, %p4452_p9 }
0x1f78   : > { %p4450_p8 = pneg %p4449_p7 }
0x1f79   : > { %p4456_p13 = por %p4455_p12, %p4454_p11 }
0x1f7b   : > { %p4457_p0 = pnand %p4456_p13, %p4450_p8 }
0x1f7d   : > { %4460 = shalt.err (!%p4457_p0)
}
0x1f7e   : > { %4340 = dma.vmem_to_hbm [thread:$0]  (%p4656_p5), %s5358_s1, 128, %s5356_s2, %s3548_s20  }
0x1f7f PF: > { %s5475_s6 = sld [smem:[#allocation7_spill]]  ;;  %s5476_s4 = sld [smem:[#allocation5_spill]] }
0x1f85   : > { %p4346_p1 = scmp.ge.s32.totalorder %s5475_s6, 2  ;;  %s3580_s0 = sand.u32 1, %s5476_s4  }
0x1f86   : > { %s3581_s26 = scalar_lea.sflag [#allocation3], %s3580_s0 }
0x1f87   : > { %p4343_p2 = pnand %p4346_p1, %p4660_p6 }
0x1f89   : > { %4478 = dma.done.wait (!%p4343_p2), %s3581_s26, 128  }
0x1f8a   : > { %4480 = vsyncadd (!%p4343_p2), %s3581_s26, 4294967168  ;;  %s5478_s27 = sld [smem:[#allocation8_spill]]  ;;  %s5479_s24 = sld [smem:[#allocation6_spill]] }
0x1f8b   : > { %s5480_s26 = sld [smem:[#allocation9_spill]]  ;;  %s5481_s2 = smov %s4487_s25 }
0x1f90   : > { %p32_p3 = scmp.ge.s32.totalorder %s5478_s27, 4   ;;  %s5482_s25 = smov %s5479_s24 }
0x1f92   :  { %34 = sbr.rel (!%p32_p3) target bundleno = 12 (0xc), region = 152 }
0x1f99   :  { %3593 = vsyncpa [#allocation3], 1 }
0x1f9a   :  { %3595 = vsyncpa [#allocation3 + $0x1], 1 }

</bundles_post_ra>
